<compile_context>
chip_gen: v5e
topology: v5e:2x2
jax: 0.10.0
libtpu: 0.0.40
codegen_flags: <defaults>
</compile_context>

<pallas_src>
import functools
import math

import jax
import jax.numpy as jnp
from jax import lax
from jax.experimental import pallas as pl
from jax.experimental.pallas import tpu as pltpu


# ------------------------------------ kernel ------------------------------------
def _up_kernel(linear, ipb, N, Wo, *refs):
    """One grid step = `ipb` whole images packed on the lane axis (channels on sublanes).

    refs (linear=False, fc1 folded into DWConv):
        x, ind, U, masks, wfold, biasmap, w2, b2, out, unp_scratch, stack_scratch
    refs (linear=True, explicit fc1 -> ReLU):
        x, ind, U, masks, w1, b1, wstack, bdw, w2, b2, out, unp_scratch, stack_scratch
    """
    if linear:
        (x_ref, ind_ref, u_ref, m_ref,
         w1_ref, b1_ref, wstack_ref, bdw_ref, w2_ref, b2_ref,
         o_ref, unp_ref, stack_ref) = refs
    else:
        (x_ref, ind_ref, u_ref, m_ref,
         wfold_ref, bm_ref, w2_ref, b2_ref,
         o_ref, unp_ref, stack_ref) = refs

    LB = ipb * N
    f32 = jnp.float32

    # ---- MaxUnpool2d(2, 2), fused ------------------------------------------------------
    # Constant 0/1 upsample matrix broadcasts each pooled value (and its stored index) to
    # its 2x2 output window via a tiny MXU matmul; a lane-iota compare keeps only the
    # position the index points at.  Exact for MaxPool2d(2,2)-produced indices.
    qpos = lax.broadcasted_iota(jnp.int32, (1, N), 1).astype(f32)      # in-image linear idx
    u = u_ref[...]                                                     # (Hs*Ws, N)
    for i in range(ipb):                                               # static, tiny
        xu = jnp.dot(x_ref[i], u, preferred_element_type=f32)          # (Cin, N)
        iu = jnp.dot(ind_ref[i].astype(f32), u, preferred_element_type=f32)
        unp_ref[:, pl.ds(i * N, N)] = jnp.where(iu == qpos, xu, 0.0)
    a = unp_ref[...]                                                   # (Cin, LB)

    # ---- fc1 (1x1 conv) ------------------------------------------------------------------
    if linear:
        # ReLU sits between fc1 and the DWConv -> fc1 cannot be folded; keep it explicit.
        h = jnp.dot(w1_ref[...], a, preferred_element_type=f32) + b1_ref[...]
        src = jnp.maximum(h, 0.0)
        wmat_ref, bias = wstack_ref, bdw_ref[...]                      # bias (Hid, 1)
    else:
        # fc1 folded into the DWConv: wfold[:, t*Cin:(t+1)*Cin] = Wdw_t @ W1, and b1's
        # contribution through the boundary masks is the precomputed bias map.
        src = a
        wmat_ref, bias = wfold_ref, bm_ref[...]                        # bias (Hid, LB)

    # ---- grouped 3x3 DWConv, stride 1, pad 1 ----------------------------------------------
    # 9 lane rolls (XLU) x precomputed 0/1 masks, written straight into a VMEM scratch
    # (caps live vregs at ~1 tap), then ONE fused K = 9*C MXU matmul.  Masks are built from
    # per-image positions, so circular rolls never leak across packed images.
    C = src.shape[0]
    t = 0
    for dy in (-1, 0, 1):
        for dx in (-1, 0, 1):
            d = dy * Wo + dx                                           # static
            s = src if d == 0 else pltpu.roll(src, (-d) % LB, 1)
            stack_ref[pl.ds(t * C, C), :] = s * m_ref[pl.ds(t, 1), :]
            t += 1
    conv = jnp.dot(wmat_ref[...], stack_ref[...], preferred_element_type=f32) + bias

    # ---- GELU (erf-based, exact torch.nn.GELU default) ------------------------------------
    g = 0.5 * conv * (1.0 + lax.erf(conv * (1.0 / math.sqrt(2.0))))

    # ---- fc2 (1x1 conv) --------------------------------------------------------------------
    out = jnp.dot(w2_ref[...], g, preferred_element_type=f32) + b2_ref[...]   # (Cout, LB)
    for i in range(ipb):
        o_ref[i] = out[:, i * N:(i + 1) * N].astype(o_ref.dtype)
    # TODO(synk): nn.Dropout(p=0.0) is identity; no stochastic dropout implemented.


# -------------------------------- constant builders --------------------------------
def _unpool_gather_matrix(Hs, Ws, Ho, Wo):
    """(Hs*Ws, Ho*Wo) 0/1 matrix: U[p, q] = 1 iff output pixel q lies in input p's 2x2 window."""
    q = jnp.arange(Ho * Wo)
    parent = (q // Wo // 2) * Ws + (q % Wo) // 2
    return (jnp.arange(Hs * Ws)[:, None] == parent[None, :]).astype(jnp.float32)


def _tap_masks(Ho, Wo):
    """(9, Ho*Wo) 0/1 validity of each 3x3 tap per output pixel (t = (dy+1)*3 + (dx+1))."""
    q = jnp.arange(Ho * Wo)
    row, col = q // Wo, q % Wo
    rows = []
    for dy in (-1, 0, 1):
        for dx in (-1, 0, 1):
            ok = ((row + dy >= 0) & (row + dy < Ho) &
                  (col + dx >= 0) & (col + dx < Wo))
            rows.append(ok.astype(jnp.float32))
    return jnp.stack(rows, axis=0)


def _dense_tap_weights(Wdw, groups):
    """Grouped (Hid, Hid//groups, 3, 3) conv weight -> dense (9, Hid, Hid) per-tap matrices."""
    Hid, cpg, _, _ = Wdw.shape
    ocpg = Hid // groups
    dense = jnp.zeros((3, 3, Hid, Hid), Wdw.dtype)
    for g in range(groups):
        blk = jnp.transpose(Wdw[g * ocpg:(g + 1) * ocpg], (2, 3, 0, 1))   # (3,3,ocpg,cpg)
        dense = dense.at[:, :, g * ocpg:(g + 1) * ocpg, g * cpg:(g + 1) * cpg].set(blk)
    return dense.reshape(9, Hid, Hid)                                     # t = ky*3 + kx


# --------------------------------------- wrapper ---------------------------------------
def up_pallas(x, indices, output_hw, W1, b1, Wdw, bdw, W2, b2, groups,
              linear=False, num_blocks=None):
    """Up.forward (MaxUnpool2d(2,2) + Mlp) as one fused Pallas call.  NCHW in / NCHW out.

    `indices` must come from MaxPool2d(2, 2) (each index lies inside its own 2x2 window),
    which is how the surrounding network produces them.
    """
    B, Cin, Hs, Ws = x.shape
    Ho, Wo = output_hw
    assert (Ho, Wo) == (2 * Hs, 2 * Ws), "Up always unpools by exactly 2x"
    N = Ho * Wo
    Hid = W1.shape[0]
    Cout = W2.shape[0]

    # Batch folded onto lanes; each grid step handles `ipb` whole images.  Default keeps 2
    # parallel blocks (both v7x TensorCores busy); num_blocks=1 fully collapses the grid
    # (best on single-TC v5e/v6e since each step carries ~0.35 us overhead).
    if num_blocks is None:
        num_blocks = 2 if (B % 2 == 0 and B >= 2) else 1
    assert B % num_blocks == 0
    ipb = B // num_blocks
    LB = ipb * N

    masks = _tap_masks(Ho, Wo)                          # (9, N)
    u_mat = _unpool_gather_matrix(Hs, Ws, Ho, Wo)       # (Hs*Ws, N)
    dense = _dense_tap_weights(Wdw, groups)             # (9, Hid, Hid)

    x3 = x.reshape(B, Cin, Hs * Ws)                     # free reshapes, NCHW-native
    ind3 = indices.reshape(B, Cin, Hs * Ws)
    masks_t = jnp.tile(masks, (1, ipb))                 # (9, LB) per-image pattern repeated

    hp = lax.Precision.HIGHEST                          # one-time constant packing in f32
    if linear:
        wstack = jnp.transpose(dense, (1, 0, 2)).reshape(Hid, 9 * Hid)
        weight_args = (W1, b1[:, None], wstack, bdw[:, None], W2, b2[:, None])
        c_roll = Hid
    else:
        wfold = jnp.einsum('toh,hc->toc', dense, W1, precision=hp)         # (9, Hid, Cin)
        wfold = jnp.transpose(wfold, (1, 0, 2)).reshape(Hid, 9 * Cin)
        bias_map = (jnp.einsum('toh,h->ot', dense, b1, precision=hp) @ masks
                    + bdw[:, None])                                        # (Hid, N)
        bias_map = jnp.tile(bias_map, (1, ipb))                            # (Hid, LB)
        weight_args = (wfold, bias_map, W2, b2[:, None])
        c_roll = Cin

    inputs = (x3, ind3, u_mat, masks_t) + weight_args

    def _const(arr):
        nd = arr.ndim
        return pl.BlockSpec(arr.shape, lambda *_: (0,) * nd)

    in_specs = [pl.BlockSpec((ipb, Cin, Hs * Ws), lambda blk: (blk, 0, 0)),
                pl.BlockSpec((ipb, Cin, Hs * Ws), lambda blk: (blk, 0, 0))]
    in_specs += [_const(a) for a in inputs[2:]]

    flops = int(B * (4 * Cin * Hs * Ws * N                 # unpool gathers (values + indices)
                     + 2 * N * 9 * c_roll * Hid            # fused DWConv (K = 9*C)
                     + 2 * N * Cout * Hid                  # fc2
                     + (2 * N * Hid * Cin if linear else 0)))
    bytes_accessed = int(sum(a.size * a.dtype.itemsize for a in inputs) + B * Cout * N * 4)
    cost = pl.CostEstimate(flops=flops, transcendentals=int(B * Hid * N),
                           bytes_accessed=bytes_accessed)

    kernel = functools.partial(_up_kernel, linear, ipb, N, Wo)
    out = pl.pallas_call(
        kernel,
        out_shape=jax.ShapeDtypeStruct((B, Cout, N), jnp.float32),
        grid=(num_blocks,),
        in_specs=in_specs,
        out_specs=pl.BlockSpec((ipb, Cout, N), lambda blk: (blk, 0, 0)),
        scratch_shapes=[pltpu.VMEM((Cin, LB), jnp.float32),          # fused-unpool result
                        pltpu.VMEM((9 * c_roll, LB), jnp.float32)],  # stacked DWConv taps
        compiler_params=pltpu.CompilerParams(
            dimension_semantics=("parallel",),
            vmem_limit_bytes=8 * 1024 * 1024),
        cost_estimate=cost,
    )(*inputs)

    return out.reshape(B, Cout, Ho, Wo)


# ---------------------------- pure-JAX reference (PyTorch semantics) ----------------------------
def max_unpool2d_ref(x, ind, out_hw):
    B, C, H, W = x.shape
    Ho, Wo = out_hw
    out = jnp.zeros((B, C, Ho * Wo), x.dtype)
    bidx = jnp.arange(B)[:, None, None]
    cidx = jnp.arange(C)[None, :, None]
    out = out.at[bidx, cidx, ind.reshape(B, C, H * W)].set(x.reshape(B, C, H * W))
    return out.reshape(B, C, Ho, Wo)


def up_reference(x, ind, out_hw, W1_pt, b1, Wdw_pt, bdw, W2_pt, b2, groups, linear=False):
    u = max_unpool2d_ref(x, ind, out_hw)
    h = jnp.einsum('bchw,oc->bohw', u, W1_pt,
                   precision=lax.Precision.HIGHEST) + b1[None, :, None, None]
    if linear:
        h = jnp.maximum(h, 0.0)
    h = lax.conv_general_dilated(
        h, Wdw_pt, window_strides=(1, 1), padding=((1, 1), (1, 1)),
        dimension_numbers=('NCHW', 'OIHW', 'NCHW'),
        feature_group_count=groups,
        precision=lax.Precision.HIGHEST) + bdw[None, :, None, None]
    h = 0.5 * h * (1.0 + lax.erf(h / jnp.sqrt(2.0)))
    out = jnp.einsum('bchw,oc->bohw', h, W2_pt,
                     precision=lax.Precision.HIGHEST) + b2[None, :, None, None]
    return out


if __name__ == "__main__":
    # Shapes consistent with the module: Up unpools (B, C, H, W) -> (B, C, 2H, 2W), then the
    # Mlp with in_features=16, out_features=64 -> hidden = 64 // 4 = 16, dwconv groups = 4.
    B, Cin, Cout, H, W = 2, 16, 64, 8, 8
    Ho, Wo = 2 * H, 2 * W
    Hid = Cout // 4
    groups = Hid // 4

    key = jax.random.PRNGKey(0)
    kx, ka, kb, k1, k2, k3, k4, k5, k6 = jax.random.split(key, 9)
    x = jax.random.normal(kx, (B, Cin, H, W), jnp.float32)

    # MaxPool2d(2,2)-style indices: each index points inside its own 2x2 output window.
    a_off = jax.random.randint(ka, (B, Cin, H, W), 0, 2)
    b_off = jax.random.randint(kb, (B, Cin, H, W), 0, 2)
    rows = 2 * jnp.arange(H, dtype=jnp.int32)[:, None] + a_off
    cols = 2 * jnp.arange(W, dtype=jnp.int32)[None, :] + b_off
    indices = (rows * Wo + cols).astype(jnp.int32)

    # PyTorch-style Conv2d weights; small non-zero biases for coverage.
    W1_pt = math.sqrt(2.0 / (1 * 1 * Hid)) * jax.random.normal(k1, (Hid, Cin), jnp.float32)
    b1 = 0.05 * jax.random.normal(k4, (Hid,), jnp.float32)
    fan_out_dw = (3 * 3 * Hid) // groups
    Wdw_pt = math.sqrt(2.0 / fan_out_dw) * jax.random.normal(
        k2, (Hid, Hid // groups, 3, 3), jnp.float32)
    bdw = 0.05 * jax.random.normal(k5, (Hid,), jnp.float32)
    W2_pt = math.sqrt(2.0 / (1 * 1 * Cout)) * jax.random.normal(k3, (Cout, Hid), jnp.float32)
    b2 = 0.05 * jax.random.normal(k6, (Cout,), jnp.float32)

    def check(out, ref, tag):
        assert out.shape == (B, Cout, Ho, Wo), (tag, out.shape)
        err = float(jnp.max(jnp.abs(out - ref)))
        assert jnp.allclose(out, ref, atol=1e-2, rtol=1e-2), f"{tag}: max abs err {err}"

    ref_nl = up_reference(x, indices, (Ho, Wo), W1_pt, b1, Wdw_pt, bdw, W2_pt, b2,
                          groups, linear=False)
    ref_l = up_reference(x, indices, (Ho, Wo), W1_pt, b1, Wdw_pt, bdw, W2_pt, b2,
                         groups, linear=True)

    # Default: 2 parallel lane blocks (one image each) -> both v7x TensorCores busy.
    out = jax.block_until_ready(
        up_pallas(x, indices, (Ho, Wo), W1_pt, b1, Wdw_pt, bdw, W2_pt, b2, groups,
                  linear=False))
    check(out, ref_nl, "default-2blk")

    # Fully collapsed grid: batch folded onto 512 lanes, single step (v5e/v6e overhead path).
    out1 = jax.block_until_ready(
        up_pallas(x, indices, (Ho, Wo), W1_pt, b1, Wdw_pt, bdw, W2_pt, b2, groups,
                  linear=False, num_blocks=1))
    check(out1, ref_nl, "collapsed-1blk")

    # linear=True path (explicit fc1 + ReLU, unfolded DWConv weight).
    out_l = jax.block_until_ready(
        up_pallas(x, indices, (Ho, Wo), W1_pt, b1, Wdw_pt, bdw, W2_pt, b2, groups,
                  linear=True))
    check(out_l, ref_l, "linear=True")

    print("KERNEL_OK")
</pallas_src>

<mosaic_0001>
module attributes {stable_mosaic.version = 11 : i64} {
  func.func @_up_kernel(%arg0: i32, %arg1: memref<1x16x64xf32, #tpu.memory_space<vmem>>, %arg2: memref<1x16x64xi32, #tpu.memory_space<vmem>>, %arg3: memref<64x256xf32, #tpu.memory_space<vmem>>, %arg4: memref<9x256xf32, #tpu.memory_space<vmem>>, %arg5: memref<16x144xf32, #tpu.memory_space<vmem>>, %arg6: memref<16x256xf32, #tpu.memory_space<vmem>>, %arg7: memref<64x16xf32, #tpu.memory_space<vmem>>, %arg8: memref<64x1xf32, #tpu.memory_space<vmem>>, %arg9: memref<1x64x256xf32, #tpu.memory_space<vmem>>, %arg10: memref<16x256xf32, #tpu.memory_space<vmem>>, %arg11: memref<144x256xf32, #tpu.memory_space<vmem>>) attributes {dimension_semantics = [#tpu.dimension_semantics<parallel>], iteration_bounds = array<i64: 2>, scalar_prefetch = 0 : i64, scratch_operands = 2 : i64, tpu.core_type = #tpu.core_type<tc>, window_params = [{transform_indices = @transform_0, window_bounds = array<i64: 1, 16, 64>}, {transform_indices = @transform_1, window_bounds = array<i64: 1, 16, 64>}, {pipeline_mode = #tpu.pipeline_mode<synchronous>, transform_indices = @transform_2, window_bounds = array<i64: 64, 256>}, {pipeline_mode = #tpu.pipeline_mode<synchronous>, transform_indices = @transform_3, window_bounds = array<i64: 9, 256>}, {pipeline_mode = #tpu.pipeline_mode<synchronous>, transform_indices = @transform_4, window_bounds = array<i64: 16, 144>}, {pipeline_mode = #tpu.pipeline_mode<synchronous>, transform_indices = @transform_5, window_bounds = array<i64: 16, 256>}, {pipeline_mode = #tpu.pipeline_mode<synchronous>, transform_indices = @transform_6, window_bounds = array<i64: 64, 16>}, {pipeline_mode = #tpu.pipeline_mode<synchronous>, transform_indices = @transform_7, window_bounds = array<i64: 64, 1>}, {transform_indices = @transform_8, window_bounds = array<i64: 1, 64, 256>}]} {
    %0 = tpu.iota {dimensions = array<i32: 1>} : vector<1x256xi32>
    %1 = arith.sitofp %0 : vector<1x256xi32> to vector<1x256xf32>
    %c0 = arith.constant 0 : index
    %c0_0 = arith.constant 0 : index
    %2 = vector.load %arg3[%c0, %c0_0] : memref<64x256xf32, #tpu.memory_space<vmem>>, vector<64x256xf32>
    %c0_1 = arith.constant 0 : index
    %c0_2 = arith.constant 0 : index
    %c0_3 = arith.constant 0 : index
    %3 = vector.load %arg1[%c0_1, %c0_2, %c0_3] : memref<1x16x64xf32, #tpu.memory_space<vmem>>, vector<1x16x64xf32>
    %4 = vector.shape_cast %3 : vector<1x16x64xf32> to vector<16x64xf32>
    %cst = arith.constant dense<0.000000e+00> : vector<16x256xf32>
    %5 = tpu.matmul %4, %2, %cst {dimension_numbers = #tpu.dot_dimension_numbers<[1], [0], [0], [1], [0, 0, 1, 1], [], []>} : vector<16x64xf32>, vector<64x256xf32>, vector<16x256xf32> -> vector<16x256xf32>
    %c0_4 = arith.constant 0 : index
    %c0_5 = arith.constant 0 : index
    %c0_6 = arith.constant 0 : index
    %6 = vector.load %arg2[%c0_4, %c0_5, %c0_6] : memref<1x16x64xi32, #tpu.memory_space<vmem>>, vector<1x16x64xi32>
    %7 = vector.shape_cast %6 : vector<1x16x64xi32> to vector<16x64xi32>
    %8 = arith.sitofp %7 : vector<16x64xi32> to vector<16x64xf32>
    %cst_7 = arith.constant dense<0.000000e+00> : vector<16x256xf32>
    %9 = tpu.matmul %8, %2, %cst_7 {dimension_numbers = #tpu.dot_dimension_numbers<[1], [0], [0], [1], [0, 0, 1, 1], [], []>} : vector<16x64xf32>, vector<64x256xf32>, vector<16x256xf32> -> vector<16x256xf32>
    %10 = vector.broadcast %1 : vector<1x256xf32> to vector<16x256xf32>
    %11 = arith.cmpf oeq, %9, %10 : vector<16x256xf32>
    %cst_8 = arith.constant 0.000000e+00 : f32
    %12 = vector.broadcast %cst_8 : f32 to vector<16x256xf32>
    %13 = arith.select %11, %5, %12 : vector<16x256xi1>, vector<16x256xf32>
    %c0_9 = arith.constant 0 : index
    %c0_10 = arith.constant 0 : index
    %14 = vector.load %arg10[%c0_9, %c0_10] : memref<16x256xf32, #tpu.memory_space<vmem>>, vector<16x256xf32>
    tpu.vector_store %arg10[%c0_9, %c0_10], %13 {strides = array<i32>} : memref<16x256xf32, #tpu.memory_space<vmem>>, vector<16x256xf32>,
    %c0_11 = arith.constant 0 : index
    %c0_12 = arith.constant 0 : index
    %15 = vector.load %arg10[%c0_11, %c0_12] : memref<16x256xf32, #tpu.memory_space<vmem>>, vector<16x256xf32>
    %c0_13 = arith.constant 0 : index
    %c0_14 = arith.constant 0 : index
    %16 = vector.load %arg6[%c0_13, %c0_14] : memref<16x256xf32, #tpu.memory_space<vmem>>, vector<16x256xf32>
    %c17_i32 = arith.constant 17 : i32
    %17 = tpu.dynamic_rotate %15 by %c17_i32 dim 1 : vector<16x256xf32>, i32 -> vector<16x256xf32>
    %c0_15 = arith.constant 0 : index
    %c0_16 = arith.constant 0 : index
    %18 = vector.load %arg4[%c0_15, %c0_16] : memref<9x256xf32, #tpu.memory_space<vmem>>, vector<1x256xf32>
    %19 = vector.broadcast %18 : vector<1x256xf32> to vector<16x256xf32>
    %20 = arith.mulf %17, %19 : vector<16x256xf32>
    %c0_17 = arith.constant 0 : index
    %c0_18 = arith.constant 0 : index
    %21 = vector.load %arg11[%c0_17, %c0_18] : memref<144x256xf32, #tpu.memory_space<vmem>>, vector<16x256xf32>
    tpu.vector_store %arg11[%c0_17, %c0_18], %20 {strides = array<i32>} : memref<144x256xf32, #tpu.memory_space<vmem>>, vector<16x256xf32>,
    %c16_i32 = arith.constant 16 : i32
    %22 = tpu.dynamic_rotate %15 by %c16_i32 dim 1 : vector<16x256xf32>, i32 -> vector<16x256xf32>
    %c1 = arith.constant 1 : index
    %c0_19 = arith.constant 0 : index
    %23 = vector.load %arg4[%c1, %c0_19] : memref<9x256xf32, #tpu.memory_space<vmem>>, vector<1x256xf32>
    %24 = vector.broadcast %23 : vector<1x256xf32> to vector<16x256xf32>
    %25 = arith.mulf %22, %24 : vector<16x256xf32>
    %c16 = arith.constant 16 : index
    %c0_20 = arith.constant 0 : index
    %26 = vector.load %arg11[%c16, %c0_20] : memref<144x256xf32, #tpu.memory_space<vmem>>, vector<16x256xf32>
    tpu.vector_store %arg11[%c16, %c0_20], %25 {strides = array<i32>} : memref<144x256xf32, #tpu.memory_space<vmem>>, vector<16x256xf32>,
    %c15_i32 = arith.constant 15 : i32
    %27 = tpu.dynamic_rotate %15 by %c15_i32 dim 1 : vector<16x256xf32>, i32 -> vector<16x256xf32>
    %c2 = arith.constant 2 : index
    %c0_21 = arith.constant 0 : index
    %28 = vector.load %arg4[%c2, %c0_21] : memref<9x256xf32, #tpu.memory_space<vmem>>, vector<1x256xf32>
    %29 = vector.broadcast %28 : vector<1x256xf32> to vector<16x256xf32>
    %30 = arith.mulf %27, %29 : vector<16x256xf32>
    %c32 = arith.constant 32 : index
    %c0_22 = arith.constant 0 : index
    %31 = vector.load %arg11[%c32, %c0_22] : memref<144x256xf32, #tpu.memory_space<vmem>>, vector<16x256xf32>
    tpu.vector_store %arg11[%c32, %c0_22], %30 {strides = array<i32>} : memref<144x256xf32, #tpu.memory_space<vmem>>, vector<16x256xf32>,
    %c1_i32 = arith.constant 1 : i32
    %32 = tpu.dynamic_rotate %15 by %c1_i32 dim 1 : vector<16x256xf32>, i32 -> vector<16x256xf32>
    %c3 = arith.constant 3 : index
    %c0_23 = arith.constant 0 : index
    %33 = vector.load %arg4[%c3, %c0_23] : memref<9x256xf32, #tpu.memory_space<vmem>>, vector<1x256xf32>
    %34 = vector.broadcast %33 : vector<1x256xf32> to vector<16x256xf32>
    %35 = arith.mulf %32, %34 : vector<16x256xf32>
    %c48 = arith.constant 48 : index
    %c0_24 = arith.constant 0 : index
    %36 = vector.load %arg11[%c48, %c0_24] : memref<144x256xf32, #tpu.memory_space<vmem>>, vector<16x256xf32>
    tpu.vector_store %arg11[%c48, %c0_24], %35 {strides = array<i32>} : memref<144x256xf32, #tpu.memory_space<vmem>>, vector<16x256xf32>,
    %c4 = arith.constant 4 : index
    %c0_25 = arith.constant 0 : index
    %37 = vector.load %arg4[%c4, %c0_25] : memref<9x256xf32, #tpu.memory_space<vmem>>, vector<1x256xf32>
    %38 = vector.broadcast %37 : vector<1x256xf32> to vector<16x256xf32>
    %39 = arith.mulf %15, %38 : vector<16x256xf32>
    %c64 = arith.constant 64 : index
    %c0_26 = arith.constant 0 : index
    %40 = vector.load %arg11[%c64, %c0_26] : memref<144x256xf32, #tpu.memory_space<vmem>>, vector<16x256xf32>
    tpu.vector_store %arg11[%c64, %c0_26], %39 {strides = array<i32>} : memref<144x256xf32, #tpu.memory_space<vmem>>, vector<16x256xf32>,
    %c255_i32 = arith.constant 255 : i32
    %41 = tpu.dynamic_rotate %15 by %c255_i32 dim 1 : vector<16x256xf32>, i32 -> vector<16x256xf32>
    %c5 = arith.constant 5 : index
    %c0_27 = arith.constant 0 : index
    %42 = vector.load %arg4[%c5, %c0_27] : memref<9x256xf32, #tpu.memory_space<vmem>>, vector<1x256xf32>
    %43 = vector.broadcast %42 : vector<1x256xf32> to vector<16x256xf32>
    %44 = arith.mulf %41, %43 : vector<16x256xf32>
    %c80 = arith.constant 80 : index
    %c0_28 = arith.constant 0 : index
    %45 = vector.load %arg11[%c80, %c0_28] : memref<144x256xf32, #tpu.memory_space<vmem>>, vector<16x256xf32>
    tpu.vector_store %arg11[%c80, %c0_28], %44 {strides = array<i32>} : memref<144x256xf32, #tpu.memory_space<vmem>>, vector<16x256xf32>,
    %c241_i32 = arith.constant 241 : i32
    %46 = tpu.dynamic_rotate %15 by %c241_i32 dim 1 : vector<16x256xf32>, i32 -> vector<16x256xf32>
    %c6 = arith.constant 6 : index
    %c0_29 = arith.constant 0 : index
    %47 = vector.load %arg4[%c6, %c0_29] : memref<9x256xf32, #tpu.memory_space<vmem>>, vector<1x256xf32>
    %48 = vector.broadcast %47 : vector<1x256xf32> to vector<16x256xf32>
    %49 = arith.mulf %46, %48 : vector<16x256xf32>
    %c96 = arith.constant 96 : index
    %c0_30 = arith.constant 0 : index
    %50 = vector.load %arg11[%c96, %c0_30] : memref<144x256xf32, #tpu.memory_space<vmem>>, vector<16x256xf32>
    tpu.vector_store %arg11[%c96, %c0_30], %49 {strides = array<i32>} : memref<144x256xf32, #tpu.memory_space<vmem>>, vector<16x256xf32>,
    %c240_i32 = arith.constant 240 : i32
    %51 = tpu.dynamic_rotate %15 by %c240_i32 dim 1 : vector<16x256xf32>, i32 -> vector<16x256xf32>
    %c7 = arith.constant 7 : index
    %c0_31 = arith.constant 0 : index
    %52 = vector.load %arg4[%c7, %c0_31] : memref<9x256xf32, #tpu.memory_space<vmem>>, vector<1x256xf32>
    %53 = vector.broadcast %52 : vector<1x256xf32> to vector<16x256xf32>
    %54 = arith.mulf %51, %53 : vector<16x256xf32>
    %c112 = arith.constant 112 : index
    %c0_32 = arith.constant 0 : index
    %55 = vector.load %arg11[%c112, %c0_32] : memref<144x256xf32, #tpu.memory_space<vmem>>, vector<16x256xf32>
    tpu.vector_store %arg11[%c112, %c0_32], %54 {strides = array<i32>} : memref<144x256xf32, #tpu.memory_space<vmem>>, vector<16x256xf32>,
    %c239_i32 = arith.constant 239 : i32
    %56 = tpu.dynamic_rotate %15 by %c239_i32 dim 1 : vector<16x256xf32>, i32 -> vector<16x256xf32>
    %c8 = arith.constant 8 : index
    %c0_33 = arith.constant 0 : index
    %57 = vector.load %arg4[%c8, %c0_33] : memref<9x256xf32, #tpu.memory_space<vmem>>, vector<1x256xf32>
    %58 = vector.broadcast %57 : vector<1x256xf32> to vector<16x256xf32>
    %59 = arith.mulf %56, %58 : vector<16x256xf32>
    %c128 = arith.constant 128 : index
    %c0_34 = arith.constant 0 : index
    %60 = vector.load %arg11[%c128, %c0_34] : memref<144x256xf32, #tpu.memory_space<vmem>>, vector<16x256xf32>
    tpu.vector_store %arg11[%c128, %c0_34], %59 {strides = array<i32>} : memref<144x256xf32, #tpu.memory_space<vmem>>, vector<16x256xf32>,
    %c0_35 = arith.constant 0 : index
    %c0_36 = arith.constant 0 : index
    %61 = vector.load %arg5[%c0_35, %c0_36] : memref<16x144xf32, #tpu.memory_space<vmem>>, vector<16x144xf32>
    %c0_37 = arith.constant 0 : index
    %c0_38 = arith.constant 0 : index
    %62 = vector.load %arg11[%c0_37, %c0_38] : memref<144x256xf32, #tpu.memory_space<vmem>>, vector<144x256xf32>
    %cst_39 = arith.constant dense<0.000000e+00> : vector<16x256xf32>
    %63 = tpu.matmul %61, %62, %cst_39 {dimension_numbers = #tpu.dot_dimension_numbers<[1], [0], [0], [1], [0, 0, 1, 1], [], []>} : vector<16x144xf32>, vector<144x256xf32>, vector<16x256xf32> -> vector<16x256xf32>
    %64 = arith.addf %63, %16 : vector<16x256xf32>
    %cst_40 = arith.constant 5.000000e-01 : f32
    %65 = vector.broadcast %cst_40 : f32 to vector<16x256xf32>
    %66 = arith.mulf %65, %64 : vector<16x256xf32>
    %cst_41 = arith.constant 0.707106769 : f32
    %67 = vector.broadcast %cst_41 : f32 to vector<16x256xf32>
    %68 = arith.mulf %64, %67 : vector<16x256xf32>
    %69 = math.erf %68 : vector<16x256xf32>
    %cst_42 = arith.constant 1.000000e+00 : f32
    %70 = vector.broadcast %cst_42 : f32 to vector<16x256xf32>
    %71 = arith.addf %70, %69 : vector<16x256xf32>
    %72 = arith.mulf %66, %71 : vector<16x256xf32>
    %c0_43 = arith.constant 0 : index
    %c0_44 = arith.constant 0 : index
    %73 = vector.load %arg7[%c0_43, %c0_44] : memref<64x16xf32, #tpu.memory_space<vmem>>, vector<64x16xf32>
    %cst_45 = arith.constant dense<0.000000e+00> : vector<64x256xf32>
    %74 = tpu.matmul %73, %72, %cst_45 {dimension_numbers = #tpu.dot_dimension_numbers<[1], [0], [0], [1], [0, 0, 1, 1], [], []>} : vector<64x16xf32>, vector<16x256xf32>, vector<64x256xf32> -> vector<64x256xf32>
    %c0_46 = arith.constant 0 : index
    %c0_47 = arith.constant 0 : index
    %75 = vector.load %arg8[%c0_46, %c0_47] : memref<64x1xf32, #tpu.memory_space<vmem>>, vector<64x1xf32>
    %76 = vector.broadcast %75 : vector<64x1xf32> to vector<64x256xf32>
    %77 = arith.addf %74, %76 : vector<64x256xf32>
    %c0_48 = arith.constant 0 : index
    %c0_49 = arith.constant 0 : index
    %c0_50 = arith.constant 0 : index
    %78 = vector.load %arg9[%c0_48, %c0_49, %c0_50] : memref<1x64x256xf32, #tpu.memory_space<vmem>>, vector<1x64x256xf32>
    %79 = vector.shape_cast %78 : vector<1x64x256xf32> to vector<64x256xf32>
    %80 = vector.shape_cast %77 : vector<64x256xf32> to vector<1x64x256xf32>
    tpu.vector_store %arg9[%c0_48, %c0_49, %c0_50], %80 {strides = array<i32>} : memref<1x64x256xf32, #tpu.memory_space<vmem>>, vector<1x64x256xf32>,
    return
  }
  func.func @transform_0(%arg0: i32) -> (i32, i32, i32) {
    %c0_i32 = arith.constant 0 : i32
    %c0_i32_0 = arith.constant 0 : i32
    %c0_i32_1 = arith.constant 0 : i32
    return %arg0, %c0_i32, %c0_i32_0 : i32, i32, i32
  }
  func.func @transform_1(%arg0: i32) -> (i32, i32, i32) {
    %c0_i32 = arith.constant 0 : i32
    %c0_i32_0 = arith.constant 0 : i32
    %c0_i32_1 = arith.constant 0 : i32
    return %arg0, %c0_i32, %c0_i32_0 : i32, i32, i32
  }
  func.func @transform_2(%arg0: i32) -> (i32, i32) {
    %c0_i32 = arith.constant 0 : i32
    %c0_i32_0 = arith.constant 0 : i32
    %c0_i32_1 = arith.constant 0 : i32
    return %c0_i32, %c0_i32_0 : i32, i32
  }
  func.func @transform_3(%arg0: i32) -> (i32, i32) {
    %c0_i32 = arith.constant 0 : i32
    %c0_i32_0 = arith.constant 0 : i32
    %c0_i32_1 = arith.constant 0 : i32
    return %c0_i32, %c0_i32_0 : i32, i32
  }
  func.func @transform_4(%arg0: i32) -> (i32, i32) {
    %c0_i32 = arith.constant 0 : i32
    %c0_i32_0 = arith.constant 0 : i32
    %c0_i32_1 = arith.constant 0 : i32
    return %c0_i32, %c0_i32_0 : i32, i32
  }
  func.func @transform_5(%arg0: i32) -> (i32, i32) {
    %c0_i32 = arith.constant 0 : i32
    %c0_i32_0 = arith.constant 0 : i32
    %c0_i32_1 = arith.constant 0 : i32
    return %c0_i32, %c0_i32_0 : i32, i32
  }
  func.func @transform_6(%arg0: i32) -> (i32, i32) {
    %c0_i32 = arith.constant 0 : i32
    %c0_i32_0 = arith.constant 0 : i32
    %c0_i32_1 = arith.constant 0 : i32
    return %c0_i32, %c0_i32_0 : i32, i32
  }
  func.func @transform_7(%arg0: i32) -> (i32, i32) {
    %c0_i32 = arith.constant 0 : i32
    %c0_i32_0 = arith.constant 0 : i32
    %c0_i32_1 = arith.constant 0 : i32
    return %c0_i32, %c0_i32_0 : i32, i32
  }
  func.func @transform_8(%arg0: i32) -> (i32, i32, i32) {
    %c0_i32 = arith.constant 0 : i32
    %c0_i32_0 = arith.constant 0 : i32
    %c0_i32_1 = arith.constant 0 : i32
    return %arg0, %c0_i32, %c0_i32_0 : i32, i32, i32
  }
}

</mosaic_0001>

<bundles_post_ra>
// kernel: tpu_custom_call.1
= control target key start
LH: loop header
LB: loop body
LE: loop exit
PB: predicated region body
PF: predicated region fallthrough
CT: control target
= control target key end

     0   :  { %s2534_s0 = inlined_call_operand.hbm [shape: f32[2,16,64], index: 0, kind: input, shape index: {}]   ;;  %s2535_s1 = inlined_call_operand.hbm [shape: s32[2,16,64], index: 1, kind: input, shape index: {}]   ;;  %s2536_s2 = inlined_call_operand.vmem [shape: f32[64,256], index: 2, kind: input, shape index: {}]   ;;  %s2537_s3 = inlined_call_operand.hbm [shape: f32[9,256], index: 3, kind: input, shape index: {}]   ;;  %s2538_s4 = inlined_call_operand.hbm [shape: f32[16,144], index: 4, kind: input, shape index: {}]   ;;  %s2539_s5 = inlined_call_operand.hbm [shape: f32[16,256], index: 5, kind: input, shape index: {}]   ;;  %s2540_s6 = inlined_call_operand.vmem [shape: f32[64,16], index: 6, kind: input, shape index: {}]   ;;  %s2541_s7 = inlined_call_operand.vmem [shape: f32[64,1], index: 7, kind: input, shape index: {}]   ;;  %s2542_s8 = inlined_call_operand.hbm [shape: f32[2,64,256], index: 8, kind: output, shape index: {}]  }
   0x1   :  { %2546 = sst [smem:[#allocation22_spill]] %s2534_s0 }
   0x2   :  { %2547 = sst [smem:[#allocation23_spill]] %s2537_s3 }
   0x3   :  { %2548 = sst [smem:[#allocation24_spill]] %s2538_s4 }
   0x4   :  { %2549 = sst [smem:[#allocation25_spill]] %s2539_s5 }
   0x5   :  { %13 = vsyncpa [#allocation5], 0 }
   0x6   :  { %15 = vsyncpa [#allocation5 + $0x1], 0 }
   0x7   :  { %16 = vsyncpa [#allocation8], 0 }
   0x8   :  { %18 = vsyncpa [#allocation8 + $0x1], 0 }
   0x9   :  { %19 = vsyncpa [#allocation11], 0 }
   0xa   :  { %20 = vsyncpa [#allocation6], 0 }
   0xb   :  { %22 = vsyncpa [#allocation6 + $0x1], 0  ;;  %s1898_s27 = smov 0   ;;  %s1900_s28 = smov 0  }
   0xc   :  { %s1902_s29 = smov 0   ;;  %s1904_s30 = smov 0  }
   0xd LB: > { %2550 = sst [smem:[#allocation19_spill]] %s1830_s29  ;;  %s1919_s9 = sadd.s32 4294967295, %s1834_s30   ;;  %s1834_s30 = sphi %s1904_s30, %s2566_s30   ;;  %s1830_s29 = sphi %s1902_s29, %s2568_s29   ;;  %s1826_s28 = sphi %s1900_s28, %s2570_s28   ;;  %s1822_s27 = sphi %s1898_s27, %s2569_s27  }
   0xe   : > { %s1440_s10 = sadd.s32 4294967294, %s1834_s30   ;;  %p48_p0 = scmp.ne.s32.totalorder %s1826_s28, %s1822_s27 }
   0xf   : > { %p49_p1 = scmp.eq.s32.totalorder %s1919_s9, 0  ;;  %p224_p2 = scmp.eq.s32.totalorder %s1919_s9, 1 }
  0x10   : > { %p230_p3 = scmp.eq.s32.totalorder %s1440_s10, 1  ;;  %p1441_p5 = scmp.ge.s32.totalorder %s1834_s30, 1 }
  0x11   : > { %p1928_p4 = por %p49_p1, %p48_p0  ;;  %p237_p7 = scmp.lt.s32.totalorder %s1834_s30, 3 }
  0x12   : > { %p1933_p6 = por %p230_p3, %p48_p0  ;;  %s2553_s3 = sld [smem:[#allocation23_spill]] }
  0x13   : > { %p1941_p8 = pnand %p1441_p5, %p237_p7  ;;  %s1836_s17 = smov [#allocation9]  }
  0x14   : > { %s253_s18 = sshll.u32 %s1836_s17, 4  ;;  %s2556_s4 = sld [smem:[#allocation24_spill]]  ;;  %s254_s18 = int_to_ptr.vmem [resolvable:$true] %s253_s18 }
  0x15   : > { %p1517_p9 = pneg %p1941_p8  ;;  %s1837_s23 = smov 256  }
  0x16   : > { %s1838_s24 = smov 16   ;;  %s1839_s25 = smov [#allocation10]  }
  0x17   : > { %p1949_p10 = pnand %p1517_p9, %p49_p1  ;;  %s267_s26 = sshll.u32 %s1839_s25, 4  ;;  %s268_s26 = int_to_ptr.vmem [resolvable:$true] %s267_s26 }
  0x18   : > { %s251_s15 = sshll.u32 %s2553_s3, 4  ;;  %s2557_s5 = sld [smem:[#allocation25_spill]]  ;;  %s252_s15 = int_to_ptr.hbm [resolvable:$true] %s251_s15 }
  0x19   : > { %1520 = dma.hbm_to_vmem [thread:$0]  (!%p1949_p10), %s252_s15, 512, %s254_s18, [#allocation8], %s1837_s23, %s1837_s23, %s1838_s24  }
  0x1a   : > { %s265_s22 = sshll.u32 %s2556_s4, 4  ;;  %s1840_s17 = smov [#allocation12]   ;;  %s266_s22 = int_to_ptr.hbm [resolvable:$true] %s265_s22 }
  0x1b   : > { %1523 = dma.hbm_to_vmem [thread:$0]  (!%p1949_p10), %s266_s22, 512, %s268_s26, [#allocation11], %s1837_s23, %s1837_s23, %s1838_s24  }
  0x1c   : > { %s281_s20 = sshll.u32 %s1840_s17, 4  ;;  %s1965_s15 = sadd.s32 1, %s1834_s30   ;;  %s282_s20 = int_to_ptr.vmem [resolvable:$true] %s281_s20 }
  0x1d   : > { %2558 = sst [smem:[#allocation20_spill]] %s1965_s15  ;;  %s32_s18 = ssub.s32 %s1834_s30, %s1965_s15 }
  0x1e   : > { %s279_s14 = sshll.u32 %s2557_s5, 4  ;;  %s35_s21 = sadd.s32 1, %s1830_s29  ;;  %s280_s14 = int_to_ptr.hbm [resolvable:$true] %s279_s14 }
  0x1f   : > { %1526 = dma.hbm_to_vmem [thread:$0]  (!%p1949_p10), %s280_s14, 512, %s282_s20, [#allocation11], %s1837_s23, %s1837_s23, %s1838_s24  }
  0x20   : > { %p33_p12 = scmp.eq.s32.totalorder %s32_s18, 0  ;;  %p42_p13 = scmp.ne.s32.totalorder %s1830_s29, %s1826_s28 }
  0x21   : > { %p43_p0 = scmp.eq.s32.totalorder %s1834_s30, 0  ;;  %p1541_p3 = scmp.lt.s32.totalorder %s1834_s30, 2 }
  0x22   : > { %s1977_s25 = scalar_select %p33_p12, %s1830_s29, %s35_s21  }
  0x23   : > { %p44_p5 = por %p43_p0, %p42_p13  ;;  %p1981_p7 = por %p224_p2, %p42_p13 }
  0x24   : > { %2559 = sst [smem:[#allocation21_spill]] %s1977_s25  ;;  %s301_s26 = sand.u32 1, %s1830_s29  }
  0x25   : > { %s1496_s10 = sshll.u32 %s1834_s30, 4  ;;  %s1987_s19 = sshll.u32 %s301_s26, 4 }
  0x26   : > { %s2561_s0 = sld [smem:[#allocation22_spill]]  ;;  %s305_s17 = scalar_lea.vmem [#allocation4], %s1987_s19 }
  0x27   : > { %s313_s20 = sshll.u32 %s305_s17, 4  ;;  %p1995_p9 = pnand %p1541_p3, %p44_p5  ;;  %s314_s20 = int_to_ptr.vmem [resolvable:$true] %s313_s20 }
  0x28   : > { %s332_s4 = scalar_lea.hbm %s2535_s1, %s1496_s10  ;;  %s302_s5 = scalar_lea.sflag [#allocation5], %s301_s26 }
  0x29   : > { %p1700_p10 = pneg %p1995_p9 }
  0x2c   : > { %s310_s13 = scalar_lea.hbm %s2561_s0, %s1496_s10  ;;  %s1703_s25 = scalar_lea.hbm %s2561_s0, 32 }
  0x2d   : > { %s311_s14 = sshll.u32 %s310_s13, 4  ;;  %s312_s14 = int_to_ptr.hbm [resolvable:$true] %s311_s14 }
  0x2e   : > { %s1696_s23 = sshra.s32 %s312_s14, 4  ;;  %s1697_s23 = int_to_ptr.hbm [resolvable:$true] %s1696_s23 }
  0x2f   : > { %s1698_s24 = scalar_lea.hbm %s1697_s23, 16  ;;  %p1704_p0 = scmp.lt.s32.totalorder %s1697_s23, %s2561_s0 }
  0x30   : > { %p1699_p2 = scmp.ne.s32.totalorder %s1697_s23, %s1698_s24  ;;  %p1705_p3 = scmp.lt.s32.totalorder %s1703_s25, %s1698_s24 }
  0x32   : > { %p1701_p12 = pnand %p1700_p10, %p1699_p2  ;;  %p1706_p5 = por %p1705_p3, %p1704_p0 }
  0x34   : > { %p1702_p13 = pneg %p1701_p12 }
  0x36   : > { %p1707_p11 = pnand %p1706_p5, %p1702_p13 }
  0x38   : > { %1710 = shalt.err (!%p1707_p11)
}
  0x39   : > { %s1841_s26 = smov 128   ;;  %s1842_s10 = smov 8  }
  0x3a   : > { %1530 = dma.hbm_to_vmem [thread:$0]  (!%p1995_p9), %s312_s14, 256, %s314_s20, %s302_s5, %s1841_s26, %s1841_s26, %s1842_s10  }
  0x3b   : > { %s333_s21 = sshll.u32 %s332_s4, 4  ;;  %s327_s15 = scalar_lea.vmem [#allocation7], %s1987_s19  ;;  %s334_s21 = int_to_ptr.hbm [resolvable:$true] %s333_s21 }
  0x3c   : > { %s335_s13 = sshll.u32 %s327_s15, 4  ;;  %s323_s17 = sand.u32 1, %s1834_s30   ;;  %s336_s13 = int_to_ptr.vmem [resolvable:$true] %s335_s13 }
  0x3d   : > { %s324_s29 = scalar_lea.sflag [#allocation8], %s323_s17  ;;  %s1726_s23 = sshra.s32 %s334_s21, 4  ;;  %s1727_s23 = int_to_ptr.hbm [resolvable:$true] %s1726_s23 }
  0x3e   : > { %s1728_s25 = scalar_lea.hbm %s1727_s23, 16  ;;  %s1733_s0 = scalar_lea.hbm %s2535_s1, 32 }
  0x3f   : > { %p1729_p2 = scmp.ne.s32.totalorder %s1727_s23, %s1728_s25  ;;  %p1734_p13 = scmp.lt.s32.totalorder %s1727_s23, %s2535_s1 }
  0x40   : > { %p1735_p0 = scmp.lt.s32.totalorder %s1733_s0, %s1728_s25 }
  0x41   : > { %p1731_p11 = pnand %p1729_p2, %p1700_p10 }
  0x42   : > { %p1736_p3 = por %p1735_p0, %p1734_p13 }
  0x43   : > { %p1732_p12 = pneg %p1731_p11 }
  0x45   : > { %p1737_p5 = pnand %p1736_p3, %p1732_p12 }
  0x47   : > { %1740 = shalt.err (!%p1737_p5)
}
  0x48   : > { %1533 = dma.hbm_to_vmem [thread:$0]  (!%p1995_p9), %s334_s21, 256, %s336_s13, %s324_s29, %s1841_s26, %s1841_s26, %s1842_s10  }
  0x49   : > { %347 = sbr.rel (%p1941_p8) target bundleno = 827 (0x33b), region = 52  ;;  %s2031_s15 = sand.u32 (!%p1941_p8), 1, %s1826_s28  }
  0x4a   : > { %s1453_s19 = sshll.u32 (!%p1941_p8), %s2031_s15, 4  ;;  %s350_s14 = scalar_lea.sflag (!%p1941_p8), [#allocation5], %s2031_s15 }
  0x4b   : > { %s2035_s20 = scalar_lea.vmem (!%p1941_p8), [#allocation4], %s1453_s19 }
  0x4e   : > { %1801 = dma.done.wait (%p1928_p4), %s350_s14, 256  }
  0x4f   : > { %1803 = vsyncadd (%p1928_p4), %s350_s14, 4294967040  ;;  %s359_s0 = sand.u32 1, %s1919_s9   ;;  %s2042_s18 = scalar_lea.vmem [#allocation7], %s1453_s19 }
  0x50   : > { %s360_s16 = scalar_lea.sflag [#allocation8], %s359_s0 }
  0x51   : > { %1805 = dma.done.wait (%p1928_p4), %s360_s16, 256  }
  0x52   : > { %1807 = vsyncadd (%p1928_p4), %s360_s16, 4294967040 }
  0x53   : > { %1809 = dma.done.wait (%p49_p1), [#allocation8], 512  }
  0x54   : > { %1811 = vsyncadd (%p49_p1), [#allocation8], 4294966784 }
  0x55   : > { %1813 = dma.done.wait (%p49_p1), [#allocation11], 1024  }
  0x56   : > { %1815 = vsyncadd (%p49_p1), [#allocation11], 4294966272  ;;  %v436_v0 = vld [vmem:[%s2536_s2 + $0x70] sm:$0xff]  ;;  %v434_v1 = vld [vmem:[%s2536_s2 + $0x60] sm:$0xff]  ;;  %vm440_vm0 = vcmask 523264   ;;  %v417_v22 = vlaneseq  ;;  %s1843_s19 = smov 1  }
  0x57   : > { %511 = vmatpush.msra.mxu2 %v436_v0  ;;  %455 = vmatpush.msra.mxu0 %v436_v0  ;;  %v432_v2 = vld [vmem:[%s2536_s2 + $0x50] sm:$0xff]  ;;  %v430_v3 = vld [vmem:[%s2536_s2 + $0x40] sm:$0xff]  ;;  %v437_v11 = vld [vmem:[%s2536_s2 + $0x78] sm:$0xff]  ;;  %s1844_s14 = smov 113   ;;  %s1845_s0 = smov 112   ;;  %vm847_vm13 = vcmask 130048  }
  0x58   : > { %v428_v4 = vld [vmem:[%s2536_s2 + $0x30] sm:$0xff]  ;;  %v426_v5 = vld [vmem:[%s2536_s2 + $0x20] sm:$0xff]  ;;  %v435_v12 = vld [vmem:[%s2536_s2 + $0x68] sm:$0xff]  ;;  %v2116_v23 = vand.u32 127, %v417_v22  ;;  %s1846_s16 = smov 15   ;;  %s1847_s26 = smov 127  }
  0x59   : > { %512 = vmatpush.msra.mxu2 %v434_v1  ;;  %456 = vmatpush.msra.mxu0 %v434_v1  ;;  %v493_v6 = vld [vmem:[%s2042_s18] sm:$0xff]  ;;  %v494_v13 = vld [vmem:[%s2042_s18 + $0x8] sm:$0xff]  ;;  %s1848_s10 = smov 16   ;;  %s1849_s21 = smov 17  }
  0x5a   : > { %v424_v7 = vld [vmem:[%s2536_s2 + $0x10] sm:$0xff]  ;;  %v422_v8 = vld [vmem:[%s2536_s2] sm:$0xff]  ;;  %v495_v9 = vcvt.s32.f32 %v493_v6  ;;  %v433_v14 = vld [vmem:[%s2536_s2 + $0x58] sm:$0xff]  ;;  %v496_v15 = vcvt.s32.f32 %v494_v13  ;;  %v420_v24 = vcvt.s32.f32 %v2116_v23  ;;  %v419_v31 = vadd.s32 128, %v2116_v23  ;;  %s1850_s13 = smov 111   ;;  %s1301_s25 = scalar_lea.sflag [#allocation6], %s2031_s15 }
  0x5b   : > { %513 = vmatpush.msra.mxu2 %v432_v2  ;;  %457 = vmatpush.msra.mxu0 %v432_v2  ;;  %v438_v10 = vld [vmem:[%s2035_s20] sm:$0xff]  ;;  %v431_v16 = vld [vmem:[%s2536_s2 + $0x48] sm:$0xff]  ;;  %v429_v18 = vld [vmem:[%s2536_s2 + $0x38] sm:$0xff]  ;;  %vm759_vm5 = vcmp.lt.s32.totalorder %v2116_v23, 112  ;;  %vm731_vm6 = vcmp.lt.s32.totalorder %v2116_v23, 113  ;;  %vm703_vm7 = vcmp.lt.s32.totalorder %v2116_v23, 127 }
  0x5c   : > { %v439_v17 = vld [vmem:[%s2035_s20 + $0x8] sm:$0xff]  ;;  %v421_v33 = vcvt.s32.f32 %v419_v31  ;;  %vm660_vm8 = vcmp.lt.s32.totalorder %v2116_v23, 1  ;;  %vm787_vm9 = vcmp.lt.s32.totalorder %v2116_v23, 111  ;;  %vm632_vm10 = vcmp.lt.s32.totalorder %v2116_v23, 15  ;;  %s1776_s20 = scalar_lea.hbm %s2542_s8, 256 }
  0x5d   : > { %514 = vmatpush.msra.mxu2 %v430_v3  ;;  %458 = vmatpush.msra.mxu0 %v430_v3  ;;  %v427_v19 = vld [vmem:[%s2536_s2 + $0x28] sm:$0xff]  ;;  %v425_v20 = vld [vmem:[%s2536_s2 + $0x18] sm:$0xff]  ;;  %vm604_vm11 = vcmp.lt.s32.totalorder %v2116_v23, 16  ;;  %vm577_vm12 = vcmp.lt.s32.totalorder %v2116_v23, 17  ;;  %v809_v23 = vld [vmem:[#allocation10 + $0x10] sm:$0xff] }
  0x5e   : > { %v423_v21 = vld [vmem:[%s2536_s2 + $0x8] sm:$0xff] }
  0x5f   : > { %515 = vmatpush.msra.mxu2 %v428_v4  ;;  %459 = vmatpush.msra.mxu0 %v428_v4  ;;  %v765_v56 = vld [vmem:[#allocation9 + $0x7] ss:$8 sm:$0x3]  ;;  %v737_v57 = vld [vmem:[#allocation9 + $0x6] ss:$8 sm:$0x3] }
  0x60   : > { %v767_v58 = vperm.slane %v765_v56, 0  ;;  %v768_v59 = vperm.slane %v765_v56, 1  ;;  %v739_v2 = vperm.slane %v737_v57, 0  ;;  %v740_v3 = vperm.slane %v737_v57, 1 }
  0x61   : > { %516 = vmatpush.msra.mxu2 %v426_v5  ;;  %460 = vmatpush.msra.mxu0 %v426_v5 }
  0x63   : > { %517 = vmatpush.msra.mxu2 %v424_v7  ;;  %461 = vmatpush.msra.mxu0 %v424_v7 }
  0x65   : > { %518 = vmatpush.msra.mxu2 %v422_v8  ;;  %462 = vmatpush.msra.mxu0 %v422_v8 }
  0x66   : > { %1463 = vmatmul.msk.f32.vlgmr.msra.gmra.mxu2 %vm440_vm0, %v495_v9  ;;  %1459 = vmatmul.msk.f32.vlgmr.msra.gmra.mxu0 %vm440_vm0, %v438_v10 }
  0x67   : > { %534 = vmatpush.msrb.mxu2 %v437_v11  ;;  %478 = vmatpush.msrb.mxu0 %v437_v11 }
  0x69   : > { %535 = vmatpush.msrb.mxu2 %v435_v12  ;;  %479 = vmatpush.msrb.mxu0 %v435_v12 }
  0x6b   : > { %536 = vmatpush.msrb.mxu2 %v433_v14  ;;  %480 = vmatpush.msrb.mxu0 %v433_v14 }
  0x6d   : > { %537 = vmatpush.msrb.mxu2 %v431_v16  ;;  %481 = vmatpush.msrb.mxu0 %v431_v16 }
  0x6e   : > { %1464 = vmatmul.msk.f32.gmra.mxu2 %vm440_vm0, %v496_v15  ;;  %1460 = vmatmul.msk.f32.gmra.mxu0 %vm440_vm0, %v439_v17 }
  0x6f   : > { %538 = vmatpush.msrb.mxu2 %v429_v18  ;;  %482 = vmatpush.msrb.mxu0 %v429_v18 }
  0x71   : > { %539 = vmatpush.msrb.mxu2 %v427_v19  ;;  %483 = vmatpush.msrb.mxu0 %v427_v19  ;;  %v709_v19 = vld [vmem:[#allocation9 + $0x5] ss:$8 sm:$0x3] }
  0x72   : > { %v711_v22 = vperm.slane %v709_v19, 0 }
  0x73   : > { %540 = vmatpush.msrb.mxu2 %v425_v20  ;;  %484 = vmatpush.msrb.mxu0 %v425_v20  ;;  %v681_v20 = vld [vmem:[#allocation9 + $0x4] ss:$8 sm:$0x3] }
  0x75   : > { %541 = vmatpush.msrb.mxu2 %v423_v21  ;;  %485 = vmatpush.msrb.mxu0 %v423_v21 }
  0x76   : > { %1465 = vmatmul.msk.f32.vlgmr.msrb.gmra.mxu2 %vm440_vm0, %v495_v9  ;;  %1461 = vmatmul.msk.f32.vlgmr.msrb.gmra.mxu0 %vm440_vm0, %v438_v10 }
  0x7e   : > { %1466 = vmatmul.msk.f32.gmra.mxu2 %vm440_vm0, %v496_v15  ;;  %1462 = vmatmul.msk.f32.gmra.mxu0 %vm440_vm0, %v439_v17 }
  0xe3   : > { %v464_v25 = vpop.f32.mrf.mxu0 }
  0xe9   : > { %v520_v26 = vpop.f32.mrf.mxu2 }
  0xea   : > { %vm549_vm1 = vcmp.eq.f32.partialorder %v520_v26, %v420_v24  ;;  %v683_v26 = vperm.slane %v681_v20, 0 }
  0xeb   : > { %v2119_v27 = vsel %vm549_vm1, %v464_v25, 0.0  ;;  %v467_v28 = vpop.f32.mrf.mxu0 }
  0xec   : > { %652 = vrot.lane.b32.xlu2 %v2119_v27, %s1843_s19  ;;  %723 = vrot.lane.b32.xlu0 %v2119_v27, %s1844_s14 }
  0xed   : > { %751 = vrot.lane.b32.xlu1 %v2119_v27, %s1845_s0 }
  0xf1   : > { %v523_v29 = vpop.f32.mrf.mxu2 }
  0xf2   : > { %vm551_vm2 = vcmp.eq.f32.partialorder %v523_v29, %v420_v24  ;;  %v712_v24 = vperm.slane %v709_v19, 1 }
  0xf3   : > { %v2127_v30 = vsel %vm551_vm2, %v467_v28, 0.0  ;;  %v487_v34 = vpop.f32.mrf.mxu0 }
  0xf4   : > { %624 = vrot.lane.b32.xlu0 %v2119_v27, %s1846_s16  ;;  %725 = vrot.lane.b32.xlu2 %v2127_v30, %s1844_s14 }
  0xf5   : > { %695 = vrot.lane.b32.xlu1 %v2119_v27, %s1847_s26 }
  0xf9   : > { %v543_v32 = vpop.f32.mrf.mxu2 }
  0xfa   : > { %vm550_vm3 = vcmp.eq.f32.partialorder %v543_v32, %v421_v33 }
  0xfb   : > { %v2148_v35 = vsel %vm550_vm3, %v487_v34, 0.0  ;;  %v490_v37 = vpop.f32.mrf.mxu0 }
  0xfc   : > { %697 = vrot.lane.b32.xlu2 %v2127_v30, %s1847_s26  ;;  %753 = vrot.lane.b32.xlu0 %v2127_v30, %s1845_s0 }
  0xfd   : > { %596 = vrot.lane.b32.xlu1 %v2119_v27, %s1848_s10 }
 0x101   : > { %v546_v36 = vpop.f32.mrf.mxu2 }
 0x102   : > { %vm552_vm4 = vcmp.eq.f32.partialorder %v546_v36, %v421_v33 }
 0x103   : > { %v2156_v38 = vsel %vm552_vm4, %v490_v37, 0.0  ;;  %v684_v37 = vperm.slane %v681_v20, 1  ;;  %v582_v20 = vld [vmem:[#allocation9] ss:$8 sm:$0x3] }
 0x104   : > { %598 = vrot.lane.b32.xlu2 %v2127_v30, %s1848_s10  ;;  %654 = vrot.lane.b32.xlu0 %v2127_v30, %s1843_s19 }
 0x105   : > { %626 = vrot.lane.b32.xlu1 %v2127_v30, %s1846_s16 }
 0x10c   : > { %656 = vrot.lane.b32.xlu0 %v2148_v35, %s1843_s19  ;;  %699 = vrot.lane.b32.xlu2 %v2148_v35, %s1847_s26 }
 0x10d   : > { %755 = vrot.lane.b32.xlu1 %v2148_v35, %s1845_s0 }
 0x114   : > { %729 = vrot.lane.b32.xlu2 %v2156_v38, %s1844_s14  ;;  %757 = vrot.lane.b32.xlu0 %v2156_v38, %s1845_s0 }
 0x115   : > { %727 = vrot.lane.b32.xlu1 %v2148_v35, %s1844_s14 }
 0x11c   : > { %600 = vrot.lane.b32.xlu2 %v2148_v35, %s1848_s10  ;;  %571 = vrot.lane.b32.xlu0 %v2127_v30, %s1849_s21 }
 0x11d   : > { %628 = vrot.lane.b32.xlu1 %v2148_v35, %s1846_s16 }
 0x124   : > { %630 = vrot.lane.b32.xlu2 %v2156_v38, %s1846_s16  ;;  %701 = vrot.lane.b32.xlu0 %v2156_v38, %s1847_s26  ;;  %s1458_s16 = sshll.u32 %s2031_s15, 7 }
 0x125   : > { %658 = vrot.lane.b32.xlu1 %v2156_v38, %s1843_s19  ;;  %s2481_s26 = scalar_lea.vmem [#allocation13], %s1458_s16 }
 0x126   : > { %s1313_s29 = sshll.u32 %s2481_s26, 4  ;;  %s1314_s29 = int_to_ptr.vmem [resolvable:$true] %s1313_s29 }
 0x12c   : > { %569 = vrot.lane.b32.xlu2 %v2119_v27, %s1849_s21  ;;  %573 = vrot.lane.b32.xlu0 %v2148_v35, %s1849_s21 }
 0x12d   : > { %781 = vrot.lane.b32.xlu1 %v2127_v30, %s1850_s13 }
 0x134   : > { %785 = vrot.lane.b32.xlu2 %v2156_v38, %s1850_s13  ;;  %602 = vrot.lane.b32.xlu0 %v2156_v38, %s1848_s10 }
 0x135   : > { %575 = vrot.lane.b32.xlu1 %v2156_v38, %s1849_s21  ;;  %s1498_s21 = sshll.u32 %s1919_s9, 7 }
 0x136   : > { %s1312_s17 = scalar_lea.hbm %s2542_s8, %s1498_s21 }
 0x137   : > { %s1315_s23 = sshll.u32 %s1312_s17, 4  ;;  %s1316_s23 = int_to_ptr.hbm [resolvable:$true] %s1315_s23 }
 0x138   : > { %s1770_s18 = sshra.s32 %s1316_s23, 4  ;;  %s1771_s18 = int_to_ptr.hbm [resolvable:$true] %s1770_s18 }
 0x139   : > { %s1772_s24 = scalar_lea.hbm %s1771_s18, 128  ;;  %p1777_p9 = scmp.lt.s32.totalorder %s1771_s18, %s2542_s8 }
 0x13a   : > { %p1773_p1 = scmp.ne.s32.totalorder %s1771_s18, %s1772_s24  ;;  %p1778_p10 = scmp.lt.s32.totalorder %s1776_s20, %s1772_s24 }
 0x13c   : > { %779 = vrot.lane.b32.xlu0 %v2119_v27, %s1850_s13  ;;  %p1774_p4 = pnand %p1773_p1, %p1981_p7  ;;  %p1779_p2 = por %p1778_p10, %p1777_p9 }
 0x13d   : > { %783 = vrot.lane.b32.xlu1 %v2148_v35, %s1850_s13 }
 0x13e   : > { %p1775_p8 = pneg %p1774_p4 }
 0x140   : > { %p1780_p11 = pnand %p1779_p2, %p1775_p8 }
 0x146   : > { %v2184_v39 = vpop.permute.xlu2 %652 }
 0x14e   : > { %v726_v40 = vpop.permute.xlu2 %725 }
 0x156   : > { %v2186_v41 = vpop.permute.xlu2 %697 }
 0x15e   : > { %v724_v42 = vpop.permute.xlu0 %723  ;;  %v2188_v44 = vpop.permute.xlu2 %598 }
 0x15f   : > { %v752_v43 = vpop.permute.xlu1 %751 }
 0x166   : > { %v2190_v45 = vpop.permute.xlu0 %624  ;;  %v700_v47 = vpop.permute.xlu2 %699 }
 0x167   : > { %v696_v46 = vpop.permute.xlu1 %695 }
 0x168   : > { %v704_v28 = vsel %vm703_vm7, %v696_v46, %v700_v47  ;;  %v706_v29 = vsel %vm703_vm7, %v700_v47, %v696_v46  ;;  %v689_v46 = vmul.f32 %v683_v26, %v2127_v30  ;;  %v688_v47 = vmul.f32 %v684_v37, %v2148_v35 }
 0x16e   : > { %v754_v48 = vpop.permute.xlu0 %753  ;;  %v730_v51 = vpop.permute.xlu2 %729 }
 0x16f   : > { %v2192_v49 = vpop.permute.xlu1 %596  ;;  %v733_v6 = vsel %vm731_vm6, %v726_v40, %v730_v51  ;;  %v735_v7 = vsel %vm731_vm6, %v730_v51, %v726_v40  ;;  %v715_v40 = vmul.f32 %v711_v22, %v704_v28  ;;  %v687_v51 = vmul.f32 %v683_v26, %v2119_v27 }
 0x170   : > { %v745_v13 = vmul.f32 %v739_v2, %v733_v6  ;;  %v746_v14 = vmul.f32 %v740_v3, %v735_v7  ;;  %v610_v7 = vld [vmem:[#allocation9 + $0x1] ss:$8 sm:$0x3] }
 0x176   : > { %v2194_v50 = vpop.permute.xlu0 %654  ;;  %v2200_v55 = vpop.permute.xlu2 %600 }
 0x177   : > { %v2196_v52 = vpop.permute.xlu1 %626 }
 0x17e   : > { %v2198_v53 = vpop.permute.xlu0 %656  ;;  %v2208_v10 = vpop.permute.xlu2 %630 }
 0x17f   : > { %v756_v54 = vpop.permute.xlu1 %755 }
 0x180   : > { %v760_v61 = vsel %vm759_vm5, %v752_v43, %v756_v54  ;;  %v762_v62 = vsel %vm759_vm5, %v756_v54, %v752_v43  ;;  %v2223_v43 = vld [vmem:[#allocation9 + $0x10] ss:$8 sm:$0x3]  ;;  %v638_v54 = vld [vmem:[#allocation9 + $0x2] ss:$8 sm:$0x3] }
 0x181   : > { %v771_v8 = vmul.f32 %v767_v58, %v760_v61  ;;  %v772_v9 = vmul.f32 %v768_v59, %v762_v62  ;;  %v795_v27 = vperm.slane %v2223_v43, 0  ;;  %v796_v35 = vperm.slane %v2223_v43, 1 }
 0x182   : > { %v640_v62 = vperm.slane %v638_v54, 0 }
 0x186   : > { %v758_v60 = vpop.permute.xlu0 %757  ;;  %v2219_v21 = vpop.permute.xlu2 %569 }
 0x187   : > { %v728_v63 = vpop.permute.xlu1 %727  ;;  %v761_v0 = vsel %vm759_vm5, %v754_v48, %v758_v60  ;;  %v763_v1 = vsel %vm759_vm5, %v758_v60, %v754_v48  ;;  %v666_v48 = vld [vmem:[#allocation9 + $0x3] ss:$8 sm:$0x3] }
 0x188   : > { %v773_v4 = vmul.f32 %v767_v58, %v761_v0  ;;  %v774_v5 = vmul.f32 %v768_v59, %v763_v1  ;;  %v732_v11 = vsel %vm731_vm6, %v724_v42, %v728_v63  ;;  %v734_v12 = vsel %vm731_vm6, %v728_v63, %v724_v42 }
 0x189   : > { %v743_v15 = vmul.f32 %v739_v2, %v732_v11  ;;  %v744_v16 = vmul.f32 %v740_v3, %v734_v12  ;;  %v716_v42 = vmul.f32 %v712_v24, %v706_v29  ;;  %v668_v58 = vperm.slane %v666_v48, 0 }
 0x18a   : > { %854 = vmatpush.msra.mxu0 %v773_v4  ;;  %900 = vmatpush.msra.mxu2 %v774_v5  ;;  %v669_v59 = vperm.slane %v666_v48, 1  ;;  %v641_v2 = vperm.slane %v638_v54, 1  ;;  %v636_v3 = vsel %vm632_vm10, %v2208_v10, %v2196_v52  ;;  %v634_v5 = vsel %vm632_vm10, %v2196_v52, %v2208_v10  ;;  %v810_v54 = vld [vmem:[#allocation10 + $0x18] sm:$0xff] }
 0x18b   : > { %v646_v11 = vmul.f32 %v640_v62, %v636_v3  ;;  %v612_v12 = vperm.slane %v610_v7, 0 }
 0x18c   : > { %855 = vmatpush.msra.mxu0 %v771_v8  ;;  %901 = vmatpush.msra.mxu2 %v772_v9  ;;  %v647_v10 = vmul.f32 %v641_v2, %v634_v5 }
 0x18e   : > { %856 = vmatpush.msra.mxu0 %v745_v13  ;;  %902 = vmatpush.msra.mxu2 %v746_v14  ;;  %v2214_v17 = vpop.permute.xlu0 %571  ;;  %v786_v60 = vpop.permute.xlu2 %785  ;;  %v613_v13 = vperm.slane %v610_v7, 1 }
 0x18f   : > { %v2216_v18 = vpop.permute.xlu1 %628 }
 0x190   : > { %857 = vmatpush.msra.mxu0 %v743_v15  ;;  %903 = vmatpush.msra.mxu2 %v744_v16  ;;  %v635_v9 = vsel %vm632_vm10, %v2216_v18, %v2190_v45  ;;  %v633_v52 = vsel %vm632_vm10, %v2190_v45, %v2216_v18  ;;  %v607_v16 = vsel %vm604_vm11, %v2200_v55, %v2192_v49 }
 0x191   : > { %v644_v14 = vmul.f32 %v640_v62, %v635_v9  ;;  %v645_v19 = vmul.f32 %v641_v2, %v633_v52  ;;  %v616_v29 = vmul.f32 %v612_v12, %v607_v16 }
 0x196   : > { %v702_v25 = vpop.permute.xlu0 %701 }
 0x197   : > { %v659_v31 = vpop.permute.xlu1 %658  ;;  %v705_v32 = vsel %vm703_vm7, %v2186_v41, %v702_v25  ;;  %v707_v33 = vsel %vm703_vm7, %v702_v25, %v2186_v41  ;;  %v690_v41 = vmul.f32 %v684_v37, %v2156_v38  ;;  %v661_v38 = vsel %vm660_vm8, %v2184_v39, %v2198_v53 }
 0x198   : > { %v717_v34 = vmul.f32 %v711_v22, %v705_v32  ;;  %v718_v36 = vmul.f32 %v712_v24, %v707_v33  ;;  %v662_v56 = vsel %vm660_vm8, %v2194_v50, %v659_v31  ;;  %v664_v57 = vsel %vm660_vm8, %v659_v31, %v2194_v50 }
 0x199   : > { %v663_v50 = vsel %vm660_vm8, %v2198_v53, %v2184_v39  ;;  %v674_v63 = vmul.f32 %v668_v58, %v664_v57  ;;  %v675_v0 = vmul.f32 %v669_v59, %v662_v56  ;;  %v673_v8 = vmul.f32 %v669_v59, %v661_v38  ;;  %v565_v56 = vld [vmem:[#allocation12] sm:$0xff]  ;;  %v566_v59 = vld [vmem:[#allocation12 + $0x8] sm:$0xff] }
 0x19a   : > { %858 = vmatpush.msra.mxu0 %v717_v34  ;;  %904 = vmatpush.msra.mxu2 %v718_v36  ;;  %v672_v53 = vmul.f32 %v668_v58, %v663_v50  ;;  %v605_v24 = vsel %vm604_vm11, %v2192_v49, %v2200_v55  ;;  %v584_v31 = vperm.slane %v582_v20, 0  ;;  %v585_v33 = vperm.slane %v582_v20, 1 }
 0x19c   : > { %859 = vmatpush.msra.mxu0 %v715_v40  ;;  %905 = vmatpush.msra.mxu2 %v716_v42  ;;  %v807_v42 = vld [vmem:[#allocation10] sm:$0xff] }
 0x19e   : > { %860 = vmatpush.msra.mxu0 %v689_v46  ;;  %v574_v30 = vpop.permute.xlu0 %573  ;;  %906 = vmatpush.msra.mxu2 %v690_v41 }
 0x19f   : > { %v782_v61 = vpop.permute.xlu1 %781  ;;  %v580_v34 = vsel %vm577_vm12, %v574_v30, %v2219_v21  ;;  %v578_v49 = vsel %vm577_vm12, %v2219_v21, %v574_v30 }
 0x1a0   : > { %861 = vmatpush.msra.mxu0 %v687_v51  ;;  %907 = vmatpush.msra.mxu2 %v688_v47  ;;  %v789_v1 = vsel %vm787_vm9, %v782_v61, %v786_v60  ;;  %v791_v39 = vsel %vm787_vm9, %v786_v60, %v782_v61  ;;  %v588_v37 = vmul.f32 %v584_v31, %v580_v34  ;;  %v808_v47 = vld [vmem:[#allocation10 + $0x8] sm:$0xff] }
 0x1a1   : > { %v801_v4 = vmul.f32 %v795_v27, %v789_v1  ;;  %v802_v6 = vmul.f32 %v796_v35, %v791_v39  ;;  %v589_v48 = vmul.f32 %v585_v33, %v578_v49 }
 0x1a2   : > { %862 = vmatpush.msra.mxu0 %v674_v63  ;;  %908 = vmatpush.msra.mxu2 %v675_v0 }
 0x1a3   : > { %891 = vmatpush.msra.mxu1 %v801_v4  ;;  %937 = vmatpush.msra.mxu3 %v802_v6 }
 0x1a4   : > { %863 = vmatpush.msra.mxu0 %v672_v53  ;;  %909 = vmatpush.msra.mxu2 %v673_v8  ;;  %v568_v53 = vld [vmem:[#allocation12 + $0x18] sm:$0xff] }
 0x1a6   : > { %864 = vmatpush.msra.mxu0 %v646_v11  ;;  %v603_v15 = vpop.permute.xlu0 %602  ;;  %910 = vmatpush.msra.mxu2 %v647_v10 }
 0x1a7   : > { %v576_v22 = vpop.permute.xlu1 %575  ;;  %v606_v45 = vsel %vm604_vm11, %v2188_v44, %v603_v15  ;;  %v608_v18 = vsel %vm604_vm11, %v603_v15, %v2188_v44  ;;  %v617_v44 = vmul.f32 %v613_v13, %v605_v24 }
 0x1a8   : > { %v618_v25 = vmul.f32 %v612_v12, %v608_v18  ;;  %v619_v26 = vmul.f32 %v613_v13, %v606_v45  ;;  %865 = vmatpush.msra.mxu0 %v644_v14  ;;  %v581_v28 = vsel %vm577_vm12, %v576_v22, %v2214_v17  ;;  %911 = vmatpush.msra.mxu2 %v645_v19 }
 0x1a9   : > { %v579_v32 = vsel %vm577_vm12, %v2214_v17, %v576_v22  ;;  %v590_v55 = vmul.f32 %v584_v31, %v581_v28 }
 0x1aa   : > { %866 = vmatpush.msra.mxu0 %v618_v25  ;;  %912 = vmatpush.msra.mxu2 %v619_v26  ;;  %v591_v36 = vmul.f32 %v585_v33, %v579_v32 }
 0x1ac   : > { %867 = vmatpush.msra.mxu0 %v616_v29  ;;  %913 = vmatpush.msra.mxu2 %v617_v44 }
 0x1ae   : > { %868 = vmatpush.msra.mxu0 %v590_v55  ;;  %v780_v40 = vpop.permute.xlu0 %779  ;;  %914 = vmatpush.msra.mxu2 %v591_v36 }
 0x1af   : > { %v784_v51 = vpop.permute.xlu1 %783 }
 0x1b0   : > { %v788_v17 = vsel %vm787_vm9, %v780_v40, %v784_v51  ;;  %v790_v46 = vsel %vm787_vm9, %v784_v51, %v780_v40  ;;  %869 = vmatpush.msra.mxu0 %v588_v37  ;;  %915 = vmatpush.msra.mxu2 %v589_v48 }
 0x1b1   : > { %870 = vmatmul.f32.vlgmr.msra.gmra.mxu0 %v807_v42  ;;  %v799_v21 = vmul.f32 %v795_v27, %v788_v17  ;;  %v800_v41 = vmul.f32 %v796_v35, %v790_v46  ;;  %916 = vmatmul.f32.vlgmr.msra.gmra.mxu2 %v807_v42  ;;  %v567_v35 = vld [vmem:[#allocation12 + $0x10] sm:$0xff] }
 0x1b3   : > { %892 = vmatpush.msra.mxu1 %v799_v21  ;;  %938 = vmatpush.msra.mxu3 %v800_v41 }
 0x1b4   : > { %1467 = vmatmul.msk.f32.vlgmr.msra.gmra.mxu1 %vm847_vm13, %v808_v47  ;;  %1469 = vmatmul.msk.f32.vlgmr.msra.gmra.mxu3 %vm847_vm13, %v808_v47 }
 0x1b9   : > { %873 = vmatmul.f32.gmra.mxu0 %v809_v23  ;;  %919 = vmatmul.f32.gmra.mxu2 %v809_v23 }
 0x1bc   : > { %1468 = vmatmul.msk.f32.gmra.mxu1 %vm847_vm13, %v810_v54  ;;  %1470 = vmatmul.msk.f32.gmra.mxu3 %vm847_vm13, %v810_v54 }
 0x22e   : > { %v871_v43 = vpop.f32.mrf.mxu0 }
 0x22f   : > { %v872_v57 = vadd.f32 %v871_v43, %v565_v56 }
 0x231   : > { %v894_v27 = vpop.f32.mrf.mxu1 }
 0x232   : > { %v2304_v58 = vadd.f32 %v894_v27, %v872_v57 }
 0x234   : > { %v2307_v30 = vmul.f32 0.70710677, %v2304_v58  ;;  %v917_v38 = vpop.f32.mrf.mxu2 }
 0x235   : > { %v918_v60 = vadd.f32 %v917_v38, %v566_v59 }
 0x236   : > { %v954_v50 = vmul.f32 %v2307_v30, %v2307_v30  ;;  %v874_v61 = vpop.f32.mrf.mxu0 }
 0x237   : > { %v875_v62 = vadd.f32 %v874_v61, %v567_v35  ;;  %v940_v63 = vpop.f32.mrf.mxu3 }
 0x238   : > { %v2311_v0 = vmin.f32 %v954_v50, 16.0  ;;  %v2313_v1 = vadd.f32 %v940_v63, %v918_v60 }
 0x239   : > { %v897_v2 = vpop.f32.mrf.mxu1 }
 0x23a   : > { %v956_v3 = vmul.f32 2.1237322e-06, %v2311_v0  ;;  %v2317_v4 = vmul.f32 0.70710677, %v2313_v1  ;;  %v2319_v39 = vadd.f32 %v897_v2, %v875_v62  ;;  %v967_v5 = vmul.f32 3.8918573e-05, %v2311_v0 }
 0x23c   : > { %v957_v6 = vadd.f32 0.00028619796, %v956_v3  ;;  %v994_v7 = vmul.f32 %v2317_v4, %v2317_v4  ;;  %v2325_v8 = vmul.f32 0.70710677, %v2319_v39  ;;  %v920_v9 = vpop.f32.mrf.mxu2  ;;  %v968_v11 = vadd.f32 0.001143296, %v967_v5 }
 0x23d   : > { %v921_v13 = vadd.f32 %v920_v9, %v568_v53 }
 0x23e   : > { %v958_v52 = vmul.f32 %v957_v6, %v2311_v0  ;;  %v2328_v10 = vmin.f32 %v994_v7, 16.0  ;;  %v1034_v12 = vmul.f32 %v2325_v8, %v2325_v8  ;;  %v969_v15 = vmul.f32 %v968_v11, %v2311_v0 }
 0x23f   : > { %v943_v14 = vpop.f32.mrf.mxu3 }
 0x240   : > { %v996_v16 = vmul.f32 2.1237322e-06, %v2328_v10  ;;  %v2334_v19 = vmin.f32 %v1034_v12, 16.0  ;;  %v2336_v20 = vadd.f32 %v943_v14, %v921_v13  ;;  %v970_v22 = vadd.f32 0.014752088, %v969_v15 }
 0x241   : > { %v1007_v45 = vmul.f32 3.8918573e-05, %v2328_v10  ;;  %v959_v18 = vadd.f32 0.0036580483, %v958_v52 }
 0x242   : > { %v1036_v24 = vmul.f32 2.1237322e-06, %v2334_v19  ;;  %v2341_v25 = vmul.f32 0.70710677, %v2336_v20  ;;  %v1047_v26 = vmul.f32 3.8918573e-05, %v2334_v19  ;;  %v971_v28 = vmul.f32 %v970_v22, %v2311_v0 }
 0x243   : > { %v1008_v29 = vadd.f32 0.001143296, %v1007_v45  ;;  %v997_v31 = vadd.f32 0.00028619796, %v996_v16  ;;  %v960_v55 = vmul.f32 %v959_v18, %v2311_v0 }
 0x244   : > { %v1037_v32 = vadd.f32 0.00028619796, %v1036_v24  ;;  %v1074_v44 = vmul.f32 %v2341_v25, %v2341_v25  ;;  %v1048_v33 = vadd.f32 0.001143296, %v1047_v26  ;;  %v972_v34 = vadd.f32 0.112945676, %v971_v28 }
 0x245   : > { %v1009_v49 = vmul.f32 %v1008_v29, %v2328_v10  ;;  %v998_v51 = vmul.f32 %v997_v31, %v2328_v10  ;;  %v961_v47 = vadd.f32 0.05243302, %v960_v55 }
 0x246   : > { %v1038_v36 = vmul.f32 %v1037_v32, %v2334_v19  ;;  %v2350_v37 = vmin.f32 %v1074_v44, 16.0  ;;  %v1049_v40 = vmul.f32 %v1048_v33, %v2334_v19  ;;  %v973_v42 = vmul.f32 %v972_v34, %v2311_v0 }
 0x247   : > { %v1010_v48 = vadd.f32 0.014752088, %v1009_v49  ;;  %v999_v35 = vadd.f32 0.0036580483, %v998_v51  ;;  %v962_v61 = vmul.f32 %v961_v47, %v2311_v0 }
 0x248   : > { %v1076_v17 = vmul.f32 2.1237322e-06, %v2350_v37  ;;  %v1050_v46 = vadd.f32 0.014752088, %v1049_v40  ;;  %v974_v21 = vadd.f32 0.4994258, %v973_v42 }
 0x249   : > { %v1011_v41 = vmul.f32 %v1010_v48, %v2328_v10  ;;  %v1039_v23 = vadd.f32 0.0036580483, %v1038_v36  ;;  %v1087_v54 = vmul.f32 3.8918573e-05, %v2350_v37  ;;  %v1000_v53 = vmul.f32 %v999_v35, %v2328_v10 }
 0x24a   : > { %v1077_v56 = vadd.f32 0.00028619796, %v1076_v17  ;;  %v1051_v43 = vmul.f32 %v1050_v46, %v2334_v19  ;;  %v975_v57 = vmul.f32 %v974_v21, %v2311_v0  ;;  %v963_v9 = vadd.f32 0.18741608, %v962_v61 }
 0x24b   : > { %v1012_v27 = vadd.f32 0.112945676, %v1011_v41  ;;  %v1088_v59 = vadd.f32 0.001143296, %v1087_v54  ;;  %v1040_v62 = vmul.f32 %v1039_v23, %v2334_v19  ;;  %v1001_v16 = vadd.f32 0.05243302, %v1000_v53 }
 0x24c   : > { %v1052_v38 = vadd.f32 0.112945676, %v1051_v43  ;;  %v976_v50 = vadd.f32 1.0, %v975_v57  ;;  %v1078_v2 = vmul.f32 %v1077_v56, %v2350_v37  ;;  %v964_v28 = vmul.f32 %v963_v9, %v2311_v0 }
 0x24d   : > { %v1013_v60 = vmul.f32 %v1012_v27, %v2328_v10  ;;  %v1089_v63 = vmul.f32 %v1088_v59, %v2350_v37  ;;  %v1041_v11 = vadd.f32 0.05243302, %v1040_v62  ;;  %v1002_v44 = vmul.f32 %v1001_v16, %v2328_v10 }
 0x24e   : > { %v1053_v3 = vmul.f32 %v1052_v38, %v2334_v19  ;;  %1598 = vrcp.f32 %v976_v50  ;;  %v1079_v52 = vadd.f32 0.0036580483, %v1078_v2  ;;  %v965_v55 = vadd.f32 1.1283791, %v964_v28 }
 0x24f   : > { %v1090_v6 = vadd.f32 0.014752088, %v1089_v63  ;;  %v1014_v7 = vadd.f32 0.4994258, %v1013_v60  ;;  %v1042_v24 = vmul.f32 %v1041_v11, %v2334_v19  ;;  %v988_v40 = vand.u32 2147483648, %v976_v50 }
 0x250   : > { %v1054_v5 = vadd.f32 0.4994258, %v1053_v3  ;;  %v1080_v29 = vmul.f32 %v1079_v52, %v2350_v37  ;;  %vm982_vm15 = vweird.f32 %v976_v50  ;;  %v986_v0 = vand.u32 2147483647, %v976_v50 }
 0x251   : > { %v1091_v13 = vmul.f32 %v1090_v6, %v2350_v37  ;;  %v1015_v14 = vmul.f32 %v1014_v7, %v2328_v10  ;;  %v1043_v33 = vadd.f32 0.18741608, %v1042_v24  ;;  %v1003_v17 = vadd.f32 0.18741608, %v1002_v44 }
 0x252   : > { %v1055_v12 = vmul.f32 %v1054_v5, %v2334_v19  ;;  %v1081_v36 = vadd.f32 0.05243302, %v1080_v29  ;;  %v989_v43 = vor.u32 1.1754944e-38, %v988_v40  ;;  %v966_v27 = vmul.f32 %v965_v55, %v2307_v30 }
 0x253   : > { %v1092_v45 = vadd.f32 0.112945676, %v1091_v13  ;;  %v2372_v18 = vadd.f32 1.0, %v1015_v14  ;;  %v1044_v41 = vmul.f32 %v1043_v33, %v2334_v19  ;;  %vm987_vm1 = vcmp.eq.f32.partialorder %v986_v0, 8.507059e+37 }
 0x254   : > { %v1599_v15 = vpop.eup %1598  ;;  %v2370_v22 = vadd.f32 1.0, %v1055_v12  ;;  %v1082_v56 = vmul.f32 %v1081_v36, %v2350_v37  ;;  %v1004_v19 = vmul.f32 %v1003_v17, %v2328_v10  ;;  %v946_v55 = vmul.f32 0.5, %v2304_v58 }
 0x255   : > { %v978_v26 = vmul.f32 %v1599_v15, %v976_v50  ;;  %v1093_v32 = vmul.f32 %v1092_v45, %v2350_v37  ;;  %vm983_vm14 = vweird.f32 %v1599_v15  ;;  %v1045_v60 = vadd.f32 1.1283791, %v1044_v41 }
 0x256   : > { %1600 = vrcp.f32 %v2370_v22  ;;  %vm2382_vm0 = vmor %vm982_vm15, %vm983_vm14  ;;  %v1068_v35 = vand.u32 2147483648, %v2370_v22  ;;  %v1066_v62 = vand.u32 2147483647, %v2370_v22  ;;  %v1083_v63 = vadd.f32 0.18741608, %v1082_v56  ;;  %v1123_v56 = vld [vmem:[%s2540_s6 + $0x8] sm:$0xff] }
 0x257   : > { %v979_v31 = vsub.f32 1.0, %v978_v26  ;;  %1602 = vrcp.f32 %v2372_v18  ;;  %v1094_v49 = vadd.f32 0.4994258, %v1093_v32  ;;  %vm1062_vm4 = vweird.f32 %v2370_v22 }
 0x258   : > { %v1028_v53 = vand.u32 2147483648, %v2372_v18  ;;  %v1069_v10 = vor.u32 1.1754944e-38, %v1068_v35  ;;  %vm1022_vm6 = vweird.f32 %v2372_v18  ;;  %v1026_v6 = vand.u32 2147483647, %v2372_v18  ;;  %v1137_v35 = vld [vmem:[%s2541_s7 + $0x38] sm:$0xff] }
 0x259   : > { %v980_v34 = vmul.f32 %v1599_v15, %v979_v31  ;;  %v1095_v48 = vmul.f32 %v1094_v49, %v2350_v37  ;;  %v1005_v9 = vadd.f32 1.1283791, %v1004_v19  ;;  %v1046_v11 = vmul.f32 %v1045_v60, %v2325_v8  ;;  %v1126_v19 = vld [vmem:[%s2540_s6 + $0x20] sm:$0xff]  ;;  %v1127_v60 = vld [vmem:[%s2540_s6 + $0x28] sm:$0xff] }
 0x25a   : > { %vm1067_vm7 = vcmp.eq.f32.partialorder %v1066_v62, 8.507059e+37  ;;  %v1084_v12 = vmul.f32 %v1083_v63, %v2350_v37  ;;  %v1029_v45 = vor.u32 1.1754944e-38, %v1028_v53  ;;  %vm1027_vm9 = vcmp.eq.f32.partialorder %v1026_v6, 8.507059e+37  ;;  %v1128_v62 = vld [vmem:[%s2540_s6 + $0x30] sm:$0xff]  ;;  %v1129_v63 = vld [vmem:[%s2540_s6 + $0x38] sm:$0xff] }
 0x25b   : > { %v981_v42 = vadd.f32 %v1599_v15, %v980_v34  ;;  %v2390_v54 = vadd.f32 1.0, %v1095_v48  ;;  %v948_v32 = vmul.f32 0.5, %v2319_v39  ;;  %v1122_v39 = vld [vmem:[%s2540_s6] sm:$0xff]  ;;  %v949_v58 = vmul.f32 0.5, %v2336_v20 }
 0x25c   : > { %v1601_v51 = vpop.eup %1600  ;;  %v1085_v29 = vadd.f32 1.1283791, %v1084_v12 }
 0x25d   : > { %v1603_v21 = vpop.eup %1602  ;;  %v1058_v47 = vmul.f32 %v1601_v51, %v2370_v22  ;;  %v985_v23 = vsel %vm2382_vm0, %v1599_v15, %v981_v42  ;;  %1604 = vrcp.f32 %v2390_v54  ;;  %vm1063_vm2 = vweird.f32 %v1601_v51 }
 0x25e   : > { %v1018_v57 = vmul.f32 %v1603_v21, %v2372_v18  ;;  %v990_v38 = vsel %vm987_vm1, %v989_v43, %v985_v23  ;;  %vm1023_vm3 = vweird.f32 %v1603_v21  ;;  %vm1064_vm5 = vmor %vm1062_vm4, %vm1063_vm2  ;;  %v1006_v18 = vmul.f32 %v1005_v9, %v2317_v4  ;;  %v1132_v43 = vld [vmem:[%s2541_s7 + $0x10] sm:$0xff] }
 0x25f   : > { %v1059_v59 = vsub.f32 1.0, %v1058_v47  ;;  %v991_v30 = vmul.f32 %v990_v38, %v966_v27  ;;  %vm1024_vm8 = vmor %vm1022_vm6, %vm1023_vm3  ;;  %v1108_v8 = vand.u32 2147483648, %v2390_v54  ;;  %v1106_v37 = vand.u32 2147483647, %v2390_v54  ;;  %v1131_v47 = vld [vmem:[%s2541_s7 + $0x8] sm:$0xff]  ;;  %v1125_v27 = vld [vmem:[%s2540_s6 + $0x18] sm:$0xff] }
 0x260   : > { %v1019_v50 = vsub.f32 1.0, %v1018_v57  ;;  %vm1102_vm11 = vweird.f32 %v2390_v54  ;;  %v1086_v40 = vmul.f32 %v1085_v29, %v2341_v25  ;;  %v1851_v25 = vmov 0   ;;  %v1130_v57 = vld [vmem:[%s2541_s7] sm:$0xff]  ;;  %v1133_v38 = vld [vmem:[%s2541_s7 + $0x18] sm:$0xff] }
 0x261   : > { %v1060_v61 = vmul.f32 %v1601_v51, %v1059_v59  ;;  %v1471_v22 = vclamps-f32 %v991_v30, 1.0  ;;  %v1109_v36 = vor.u32 1.1754944e-38, %v1108_v8  ;;  %vm1107_vm14 = vcmp.eq.f32.partialorder %v1106_v37, 8.507059e+37  ;;  %1596 = vset.pattern.permute.xlu0 %v1851_v25  ;;  %1597 = vset.pattern.permute.xlu1 %v1851_v25  ;;  %v1134_v59 = vld [vmem:[%s2541_s7 + $0x20] sm:$0xff] }
 0x262   : > { %v1020_v2 = vmul.f32 %v1603_v21, %v1019_v50  ;;  %v947_v23 = vmul.f32 0.5, %v2313_v1  ;;  %1145 = vperm.xlu0 %1596, %v1131_v47   ;;  %1595 = vset.pattern.permute.xlu2 %v1851_v25  ;;  %v1124_v1 = vld [vmem:[%s2540_s6 + $0x10] sm:$0xff] }
 0x263   : > { %v1061_v3 = vadd.f32 %v1601_v51, %v1060_v61  ;;  %v1605_v7 = vpop.eup %1604  ;;  %v1114_v33 = vadd.f32 1.0, %v1471_v22  ;;  %1150 = vperm.xlu1 %1597, %v1132_v43   ;;  %1140 = vperm.xlu2 %1595, %v1130_v57   ;;  %v1136_v50 = vld [vmem:[%s2541_s7 + $0x30] sm:$0xff]  ;;  %v1135_v61 = vld [vmem:[%s2541_s7 + $0x28] sm:$0xff] }
 0x264   : > { %v1021_v5 = vadd.f32 %v1603_v21, %v1020_v2  ;;  %v1098_v14 = vmul.f32 %v1605_v7, %v2390_v54  ;;  %vm1103_vm10 = vweird.f32 %v1605_v7 }
 0x265   : > { %v1065_v52 = vsel %vm1064_vm5, %v1601_v51, %v1061_v3  ;;  %vm1104_vm12 = vmor %vm1102_vm11, %vm1103_vm10  ;;  %v1118_v0 = vmul.f32 %v1114_v33, %v946_v55 }
 0x266   : > { %v1070_v13 = vsel %vm1067_vm7, %v1069_v10, %v1065_v52  ;;  %v1025_v15 = vsel %vm1024_vm8, %v1603_v21, %v1021_v5  ;;  %v1099_v24 = vsub.f32 1.0, %v1098_v14 }
 0x267   : > { %v1071_v16 = vmul.f32 %v1070_v13, %v1046_v11  ;;  %v1030_v28 = vsel %vm1027_vm9, %v1029_v45, %v1025_v15 }
 0x268   : > { %v1100_v31 = vmul.f32 %v1605_v7, %v1099_v24  ;;  %v1031_v49 = vmul.f32 %v1030_v28, %v1006_v18 }
 0x269   : > { %v1473_v26 = vclamps-f32 %v1071_v16, 1.0 }
 0x26a   : > { %v1101_v34 = vadd.f32 %v1605_v7, %v1100_v31  ;;  %v1472_v17 = vclamps-f32 %v1031_v49, 1.0  ;;  %1170 = vperm.xlu0 %1596, %v1136_v50  }
 0x26b   : > { %v1116_v44 = vadd.f32 1.0, %v1473_v26  ;;  %1160 = vperm.xlu1 %1597, %v1134_v59   ;;  %1155 = vperm.xlu2 %1595, %v1133_v38  }
 0x26c   : > { %v1105_v42 = vsel %vm1104_vm12, %v1605_v7, %v1101_v34  ;;  %v1115_v41 = vadd.f32 1.0, %v1472_v17 }
 0x26d   : > { %v1120_v4 = vmul.f32 %v1116_v44, %v948_v32  ;;  %v1110_v48 = vsel %vm1107_vm14, %v1109_v36, %v1105_v42 }
 0x26e   : > { %v1111_v51 = vmul.f32 %v1110_v48, %v1086_v40  ;;  %v1119_v20 = vmul.f32 %v1115_v41, %v947_v23 }
 0x26f   : > { %1216 = vmatpush.msrb.mxu1 %v1120_v4 }
 0x270   : > { %v1474_v46 = vclamps-f32 %v1111_v51, 1.0 }
 0x271   : > { %1217 = vmatpush.msrb.mxu1 %v1118_v0 }
 0x272   : > { %1475 = vmatmul.msk.f32.vlgmr.msrb.gmra.mxu1 %vm847_vm13, %v1122_v39  ;;  %v1117_v21 = vadd.f32 1.0, %v1474_v46 }
 0x273   : > { %1175 = vperm.xlu1 %1597, %v1137_v35   ;;  %1165 = vperm.xlu2 %1595, %v1135_v61  }
 0x274   : > { %v1121_v54 = vmul.f32 %v1117_v21, %v949_v58 }
 0x276   : > { %1257 = vmatpush.msrb.mxu3 %v1121_v54 }
 0x278   : > { %1258 = vmatpush.msrb.mxu3 %v1119_v20 }
 0x279   : > { %1483 = vmatmul.msk.f32.vlgmr.msrb.gmra.mxu3 %vm847_vm13, %v1122_v39 }
 0x27a   : > { %1476 = vmatmul.msk.f32.gmra.mxu1 %vm847_vm13, %v1123_v56 }
 0x281   : > { %1484 = vmatmul.msk.f32.gmra.mxu3 %vm847_vm13, %v1123_v56 }
 0x282   : > { %1477 = vmatmul.msk.f32.gmra.mxu1 %vm847_vm13, %v1124_v1 }
 0x289   : > { %1485 = vmatmul.msk.f32.gmra.mxu3 %vm847_vm13, %v1124_v1 }
 0x28a   : > { %1478 = vmatmul.msk.f32.gmra.mxu1 %vm847_vm13, %v1125_v27 }
 0x291   : > { %1486 = vmatmul.msk.f32.gmra.mxu3 %vm847_vm13, %v1125_v27 }
 0x292   : > { %1479 = vmatmul.msk.f32.gmra.mxu1 %vm847_vm13, %v1126_v19 }
 0x299   : > { %1487 = vmatmul.msk.f32.gmra.mxu3 %vm847_vm13, %v1126_v19 }
 0x29a   : > { %1480 = vmatmul.msk.f32.gmra.mxu1 %vm847_vm13, %v1127_v60 }
 0x2a1   : > { %1488 = vmatmul.msk.f32.gmra.mxu3 %vm847_vm13, %v1127_v60 }
 0x2a2   : > { %1481 = vmatmul.msk.f32.gmra.mxu1 %vm847_vm13, %v1128_v62 }
 0x2a9   : > { %1489 = vmatmul.msk.f32.gmra.mxu3 %vm847_vm13, %v1128_v62 }
 0x2aa   : > { %1482 = vmatmul.msk.f32.gmra.mxu1 %vm847_vm13, %v1129_v63 }
 0x2b1   : > { %1490 = vmatmul.msk.f32.gmra.mxu3 %vm847_vm13, %v1129_v63 }
 0x2bd   : > { %v1141_v2 = vpop.permute.xlu2 %1140 }
 0x2c5   : > { %v1156_v12 = vpop.permute.xlu2 %1155 }
 0x2cd   : > { %v1166_v8 = vpop.permute.xlu2 %1165 }
 0x2d4   : > { %v1146_v53 = vpop.permute.xlu0 %1145 }
 0x2d5   : > { %v1151_v6 = vpop.permute.xlu1 %1150 }
 0x2dc   : > { %v1171_v32 = vpop.permute.xlu0 %1170 }
 0x2dd   : > { %v1161_v22 = vpop.permute.xlu1 %1160 }
 0x2e5   : > { %v1176_v4 = vpop.permute.xlu1 %1175 }
 0x2ef   : > { %v1219_v3 = vpop.f32.mrf.mxu1 }
 0x2f0   : > { %v1220_v30 = vadd.f32 %v1219_v3, %v1141_v2 }
 0x2f2   : > { %1284 = vst [vmem:[%s2481_s26] sm:$0xff] %v1220_v30 }
 0x2f7   : > { %v1222_v10 = vpop.f32.mrf.mxu1 }
 0x2f8   : > { %v1223_v5 = vadd.f32 %v1222_v10, %v1146_v53 }
 0x2fa   : > { %1286 = vst [vmem:[%s2481_s26 + $0x10] sm:$0xff] %v1223_v5 }
 0x2fc   : > { %v1260_v7 = vpop.f32.mrf.mxu3 }
 0x2fd   : > { %v1261_v9 = vadd.f32 %v1260_v7, %v1141_v2 }
 0x2ff   : > { %v1225_v11 = vpop.f32.mrf.mxu1  ;;  %1285 = vst [vmem:[%s2481_s26 + $0x8] sm:$0xff] %v1261_v9 }
 0x300   : > { %v1226_v52 = vadd.f32 %v1225_v11, %v1151_v6 }
 0x302   : > { %1288 = vst [vmem:[%s2481_s26 + $0x20] sm:$0xff] %v1226_v52 }
 0x304   : > { %v1263_v13 = vpop.f32.mrf.mxu3 }
 0x305   : > { %v1264_v15 = vadd.f32 %v1263_v13, %v1146_v53 }
 0x307   : > { %v1228_v14 = vpop.f32.mrf.mxu1  ;;  %1287 = vst [vmem:[%s2481_s26 + $0x18] sm:$0xff] %v1264_v15 }
 0x308   : > { %v1229_v16 = vadd.f32 %v1228_v14, %v1156_v12 }
 0x30a   : > { %1290 = vst [vmem:[%s2481_s26 + $0x30] sm:$0xff] %v1229_v16 }
 0x30c   : > { %v1266_v45 = vpop.f32.mrf.mxu3 }
 0x30d   : > { %v1267_v24 = vadd.f32 %v1266_v45, %v1151_v6 }
 0x30f   : > { %v1231_v18 = vpop.f32.mrf.mxu1  ;;  %1289 = vst [vmem:[%s2481_s26 + $0x28] sm:$0xff] %v1267_v24 }
 0x310   : > { %v1232_v26 = vadd.f32 %v1231_v18, %v1161_v22 }
 0x312   : > { %1292 = vst [vmem:[%s2481_s26 + $0x40] sm:$0xff] %v1232_v26 }
 0x314   : > { %v1269_v28 = vpop.f32.mrf.mxu3 }
 0x315   : > { %v1270_v29 = vadd.f32 %v1269_v28, %v1156_v12 }
 0x317   : > { %v1234_v31 = vpop.f32.mrf.mxu1  ;;  %1291 = vst [vmem:[%s2481_s26 + $0x38] sm:$0xff] %v1270_v29 }
 0x318   : > { %v1235_v37 = vadd.f32 %v1234_v31, %v1166_v8 }
 0x31a   : > { %1294 = vst [vmem:[%s2481_s26 + $0x50] sm:$0xff] %v1235_v37 }
 0x31c   : > { %v1272_v44 = vpop.f32.mrf.mxu3 }
 0x31d   : > { %v1273_v33 = vadd.f32 %v1272_v44, %v1161_v22 }
 0x31f   : > { %v1237_v34 = vpop.f32.mrf.mxu1  ;;  %1293 = vst [vmem:[%s2481_s26 + $0x48] sm:$0xff] %v1273_v33 }
 0x320   : > { %v1238_v49 = vadd.f32 %v1237_v34, %v1171_v32 }
 0x322   : > { %1296 = vst [vmem:[%s2481_s26 + $0x60] sm:$0xff] %v1238_v49 }
 0x324   : > { %v1275_v55 = vpop.f32.mrf.mxu3 }
 0x325   : > { %v1276_v36 = vadd.f32 %v1275_v55, %v1166_v8 }
 0x327   : > { %v1240_v40 = vpop.f32.mrf.mxu1  ;;  %1295 = vst [vmem:[%s2481_s26 + $0x58] sm:$0xff] %v1276_v36 }
 0x328   : > { %v1241_v42 = vadd.f32 %v1240_v40, %v1176_v4 }
 0x32a   : > { %1298 = vst [vmem:[%s2481_s26 + $0x70] sm:$0xff] %v1241_v42 }
 0x32c   : > { %v1278_v0 = vpop.f32.mrf.mxu3 }
 0x32d   : > { %v1279_v48 = vadd.f32 %v1278_v0, %v1171_v32 }
 0x32f   : > { %1297 = vst [vmem:[%s2481_s26 + $0x68] sm:$0xff] %v1279_v48 }
 0x334   : > { %v1281_v39 = vpop.f32.mrf.mxu3 }
 0x335   : > { %v1282_v51 = vadd.f32 %v1281_v39, %v1176_v4 }
 0x337   : > { %1299 = vst [vmem:[%s2481_s26 + $0x78] sm:$0xff] %v1282_v51 }
 0x338   : > { %1783 = shalt.err (!%p1780_p11)
}
 0x339   : > { %s1852_s15 = smov 256  }
 0x33a   : > { %1515 = dma.vmem_to_hbm [thread:$0]  (%p1981_p7), %s1314_s29, 2048, %s1316_s23, %s1301_s25, %s1852_s15, %s1852_s15, %s1848_s10  }
 0x33b PF: > { %s1330_s19 = sand.u32 1, %s1822_s27   ;;  %p2565_p12 = scmp.ge.s32.totalorder %s1834_s30, 2 }
 0x33c   : > { %s1331_s14 = scalar_lea.sflag [#allocation6], %s1330_s19 }
 0x33d   : > { %p1535_p13 = pnand %p2565_p12, %p1933_p6 }
 0x33f   : > { %p1536_p0 = pneg %p1535_p13 }
 0x341   : > { %1817 = dma.done.wait (%p1536_p0), %s1331_s14, 2048  }
 0x342   : > { %1819 = vsyncadd (%p1536_p0), %s1331_s14, 4294965248  ;;  %s2566_s30 = sld [smem:[#allocation20_spill]]  ;;  %s2569_s27 = smov %s1826_s28 }
 0x343   : > { %s2567_s0 = sld [smem:[#allocation19_spill]] }
 0x344   : > { %s2568_s29 = sld [smem:[#allocation21_spill]] }
 0x348   : > { %p25_p3 = scmp.ge.s32.totalorder %s2566_s30, 4  }
 0x349   : > { %s2570_s28 = smov %s2567_s0 }
 0x34a   :  { %27 = sbr.rel (!%p25_p3) target bundleno = 13 (0xd), region = 130 }
 0x34f   :  { %1337 = vsyncpa [#allocation5], 1 }
 0x350   :  { %1339 = vsyncpa [#allocation5 + $0x1], 1 }
 0x351   :  { %1340 = vsyncpa [#allocation8], 1 }
 0x352   :  { %1342 = vsyncpa [#allocation8 + $0x1], 1 }
 0x353   :  { %1343 = vsyncpa [#allocation11], 1 }
 0x354   :  { %1344 = vsyncpa [#allocation6], 1 }
 0x355   :  { %1346 = vsyncpa [#allocation6 + $0x1], 1 }

</bundles_post_ra>
